<compile_context>
chip_gen: v7x
topology: tpu7x:2x2x1
jax: 0.10.0
libtpu: 0.0.40
codegen_flags: <defaults>
</compile_context>

<pallas_src>
import functools
import math

import jax
import jax.numpy as jnp
from jax.experimental import pallas as pl
from jax.experimental.pallas import tpu as pltpu


def _round_up(v, m):
    return (v + m - 1) // m * m


def _pad_to(a, shape, value=0.0):
    pads = [(0, s - d) for d, s in zip(a.shape, shape)]
    if all(p == (0, 0) for p in pads):
        return a
    return jnp.pad(a, pads, constant_values=value)


def _fused_network_kernel(*refs, num_layers, batch, eps, precision):
    """Whole-network body: num_layers x (masked-linear -> BN(train) -> ReLU).

    refs = (x, w1, bn1, w2, bn2, ..., wL, bnL, out).  Every operand is a single
    whole-array VMEM block (no grid), so intermediate activations stay in
    VMEM/vregs and never touch HBM.
    """
    x_ref = refs[0]
    o_ref = refs[-1]
    layer_refs = refs[1:-1]

    h = x_ref[...]
    m_pad = h.shape[0]
    exact_batch = (batch == m_pad)          # static: skip batch-validity masking
    inv_n = 1.0 / float(batch)

    for i in range(num_layers):
        w_ref = layer_refs[2 * i]
        bn_ref = layer_refs[2 * i + 1]
        bn = bn_ref[...]                    # (8, N_pad): rows 0/1/2 = bias/gamma/beta

        # Standard (M,K)x(K,N) contraction; the masked weight was pre-transposed
        # on the host, so the MXU consumes it natively (no XLU transpose).
        y = jax.lax.dot_general(
            h, w_ref[...],
            dimension_numbers=(((1,), (0,)), ((), ())),
            preferred_element_type=jnp.float32,
            precision=precision,
        )
        y = y + bn[0:1, :]                  # linear bias (cancelled by BN mean, kept for exactness)

        # Training-mode BatchNorm1d statistics over the valid batch rows.
        if exact_batch:
            mean = jnp.mean(y, axis=0, keepdims=True)
            cent = y - mean
            var = jnp.mean(cent * cent, axis=0, keepdims=True)
        else:
            rows = jax.lax.broadcasted_iota(jnp.int32, y.shape, 0)
            valid = (rows < batch).astype(jnp.float32)
            mean = jnp.sum(y * valid, axis=0, keepdims=True) * inv_n
            cent = (y - mean) * valid
            var = jnp.sum(cent * cent, axis=0, keepdims=True) * inv_n

        y = (y - mean) * jax.lax.rsqrt(var + eps)
        y = y * bn[1:2, :] + bn[2:3, :]     # BN affine
        h = jnp.maximum(y, 0.0)             # ReLU

    o_ref[...] = h


def prepare_params(raw_params):
    """One-time static prep (hoisted out of the forward path).

    Folds the static mask into the weight, transposes to (in, out), pads both
    dims to multiples of 128, and packs (bias, gamma, beta) into one
    (8, N_pad) f32 array per layer (single DMA stream, sublane-aligned).
    """
    prepped = []
    for p in raw_params:
        n, k = p["weight"].shape            # (out_features, in_features)
        k_pad = _round_up(k, 128)
        n_pad = _round_up(n, 128)
        wm = (p["weight"].astype(jnp.float32) * p["mask"].astype(jnp.float32)).T
        wm = _pad_to(wm, (k_pad, n_pad))    # (K_pad, N_pad), zero-padded
        bn = jnp.zeros((8, n_pad), jnp.float32)
        bn = bn.at[0, :n].set(p["bias"].astype(jnp.float32))
        bn = bn.at[1, :n].set(p["gamma"].astype(jnp.float32))
        bn = bn.at[2, :n].set(p["beta"].astype(jnp.float32))
        prepped.append(dict(w=wm, bn=bn,
                            in_features=int(k), out_features=int(n)))
    return prepped


def network_forward(x, prepped, *, eps=1e-5,
                    precision=jax.lax.Precision.DEFAULT):
    """Full Network forward as a single fused pallas_call."""
    b, k = x.shape
    num_layers = len(prepped)
    k0_pad = prepped[0]["w"].shape[0]
    assert k <= k0_pad
    m_pad = _round_up(max(b, 1), 8)
    n_out = prepped[-1]["out_features"]
    n_out_pad = prepped[-1]["w"].shape[1]

    x_p = _pad_to(x.astype(jnp.float32), (m_pad, k0_pad))

    args = [x_p]
    flops = 0
    bytes_accessed = x_p.size * 4 + m_pad * n_out_pad * 4
    for p in prepped:
        args += [p["w"], p["bn"]]
        kp, npad = p["w"].shape
        flops += 2 * m_pad * kp * npad + 10 * m_pad * npad
        bytes_accessed += (p["w"].size + p["bn"].size) * 4

    kernel = functools.partial(
        _fused_network_kernel,
        num_layers=num_layers, batch=b, eps=eps, precision=precision)

    cost = pl.CostEstimate(
        flops=flops,
        transcendentals=num_layers * n_out_pad,
        bytes_accessed=bytes_accessed,
    )

    out = pl.pallas_call(
        kernel,
        out_shape=jax.ShapeDtypeStruct((m_pad, n_out_pad), jnp.float32),
        cost_estimate=cost,
        # Tiny footprint (~300 KiB); a modest cap is v7x-safe (64 MiB physical).
        compiler_params=pltpu.CompilerParams(vmem_limit_bytes=32 * 1024 * 1024),
    )(*args)
    return out[:b, :n_out]


def network_reference(x, raw_params, eps=1e-5,
                      precision=jax.lax.Precision.HIGHEST):
    """Pure-JAX reference with identical training-mode BN forward semantics."""
    h = x
    for p in raw_params:
        y = jnp.dot(h, (p["weight"] * p["mask"]).T, precision=precision)
        y = y + p["bias"][None, :]
        mean = jnp.mean(y, axis=0, keepdims=True)
        var = jnp.mean((y - mean) ** 2, axis=0, keepdims=True)   # biased variance
        y = (y - mean) / jnp.sqrt(var + eps) * p["gamma"][None, :] + p["beta"][None, :]
        h = jnp.maximum(y, 0.0)
    return h


def gen_mask(key, rows, cols, percent=0.5):
    """JAX port of gen_mask: `percent` zeros, shuffled, shape (rows, cols)."""
    num_zeros = int(rows * cols * percent)
    flat = jnp.concatenate([
        jnp.zeros((num_zeros,), jnp.float32),
        jnp.ones((rows * cols - num_zeros,), jnp.float32),
    ])
    flat = jax.random.permutation(key, flat)
    return flat.reshape(rows, cols)


def init_network_params(key, in_size, out_size, hidden=50,
                        ratio=(0.5, 0.5, 0.5, 0.5)):
    dims = [(in_size, hidden), (hidden, hidden), (hidden, hidden), (hidden, out_size)]
    params = []
    for (fin, fout), r in zip(dims, ratio):
        key, kw, kb, km = jax.random.split(key, 4)
        stdv = 1.0 / math.sqrt(fin)                       # CustomizedLinear.init_params
        weight = jax.random.uniform(kw, (fout, fin), jnp.float32, -stdv, stdv)
        bias = jax.random.uniform(kb, (fout,), jnp.float32, -stdv, stdv)
        # The module receives a (fin, fout) mask and stores its transpose.
        mask = gen_mask(km, fin, fout, r).T
        params.append(dict(weight=weight, bias=bias, mask=mask,
                           gamma=jnp.ones((fout,), jnp.float32),    # BN weight=1
                           beta=jnp.zeros((fout,), jnp.float32)))   # BN bias=0
    return params


if __name__ == "__main__":
    key = jax.random.PRNGKey(0)
    k_params, k_x = jax.random.split(key)

    B, in_size, out_size = 8, 32, 16
    raw = init_network_params(k_params, in_size, out_size,
                              hidden=50, ratio=(0.5, 0.5, 0.5, 0.5))
    prepped = prepare_params(raw)          # one-time hoisted weight prep
    x = jax.random.normal(k_x, (B, in_size), jnp.float32)

    # Bit-tight f32 path (explicit HIGHEST precision only where requested),
    # checked against the pure-JAX reference with the same precision.
    fwd_hi = jax.jit(lambda xx: network_forward(
        xx, prepped, precision=jax.lax.Precision.HIGHEST))
    y = jax.block_until_ready(fwd_hi(x))
    y_ref = network_reference(x, raw, precision=jax.lax.Precision.HIGHEST)
    assert y.shape == (B, out_size)
    assert jnp.allclose(y, y_ref, atol=1e-4, rtol=1e-4), \
        float(jnp.max(jnp.abs(y - y_ref)))

    # Fast path: DEFAULT MXU precision (single-pass bf16 feed, f32 accumulation)
    # — the throughput path for v5e/v6e/v7x; sanity-checked for shape/finiteness.
    fwd_fast = jax.jit(lambda xx: network_forward(
        xx, prepped, precision=jax.lax.Precision.DEFAULT))
    y_fast = jax.block_until_ready(fwd_fast(x))
    assert y_fast.shape == (B, out_size)
    assert bool(jnp.all(jnp.isfinite(y_fast)))

    # Ragged batch (B < padded batch of 8) exercises the masked-BN branch.
    B2 = 5
    x2 = x[:B2]
    y2 = jax.block_until_ready(network_forward(
        x2, prepped, precision=jax.lax.Precision.HIGHEST))
    y2_ref = network_reference(x2, raw, precision=jax.lax.Precision.HIGHEST)
    assert y2.shape == (B2, out_size)
    assert jnp.allclose(y2, y2_ref, atol=1e-4, rtol=1e-4), \
        float(jnp.max(jnp.abs(y2 - y2_ref)))

    print("KERNEL_OK")
</pallas_src>

<mosaic_0001>
module attributes {stable_mosaic.version = 11 : i64} {
  func.func @_fused_network_kernel(%arg0: memref<8x128xf32, #tpu.memory_space<vmem>>, %arg1: memref<128x128xf32, #tpu.memory_space<vmem>>, %arg2: memref<8x128xf32, #tpu.memory_space<vmem>>, %arg3: memref<128x128xf32, #tpu.memory_space<vmem>>, %arg4: memref<8x128xf32, #tpu.memory_space<vmem>>, %arg5: memref<128x128xf32, #tpu.memory_space<vmem>>, %arg6: memref<8x128xf32, #tpu.memory_space<vmem>>, %arg7: memref<128x128xf32, #tpu.memory_space<vmem>>, %arg8: memref<8x128xf32, #tpu.memory_space<vmem>>, %arg9: memref<8x128xf32, #tpu.memory_space<vmem>>) attributes {dimension_semantics = [], scalar_prefetch = 0 : i64, scratch_operands = 0 : i64, tpu.core_type = #tpu.core_type<tc>} {
    %c0 = arith.constant 0 : index
    %c0_0 = arith.constant 0 : index
    %0 = vector.load %arg0[%c0, %c0_0] : memref<8x128xf32, #tpu.memory_space<vmem>>, vector<8x128xf32>
    %c0_1 = arith.constant 0 : index
    %c0_2 = arith.constant 0 : index
    %1 = vector.load %arg2[%c0_1, %c0_2] : memref<8x128xf32, #tpu.memory_space<vmem>>, vector<8x128xf32>
    %c0_3 = arith.constant 0 : index
    %c0_4 = arith.constant 0 : index
    %2 = vector.load %arg1[%c0_3, %c0_4] : memref<128x128xf32, #tpu.memory_space<vmem>>, vector<128x128xf32>
    %cst = arith.constant dense<0.000000e+00> : vector<8x128xf32>
    %3 = tpu.matmul %0, %2, %cst {dimension_numbers = #tpu.dot_dimension_numbers<[1], [0], [0], [1], [0, 0, 1, 1], [], []>, precision = #tpu.contract_precision<fp32>} : vector<8x128xf32>, vector<128x128xf32>, vector<8x128xf32> -> vector<8x128xf32>
    %4 = vector.extract_strided_slice %1 {offsets = [0, 0], sizes = [1, 128], strides = [1, 1]} : vector<8x128xf32> to vector<1x128xf32>
    %5 = vector.broadcast %4 : vector<1x128xf32> to vector<8x128xf32>
    %6 = arith.addf %3, %5 : vector<8x128xf32>
    %cst_5 = arith.constant dense<0.000000e+00> : vector<128xf32>
    %7 = vector.multi_reduction <add>, %6, %cst_5 [0] : vector<8x128xf32> to vector<128xf32>
    %8 = vector.shape_cast %7 : vector<128xf32> to vector<1x128xf32>
    %cst_6 = arith.constant 8.000000e+00 : f32
    %9 = vector.broadcast %cst_6 : f32 to vector<1x128xf32>
    %10 = arith.divf %8, %9 : vector<1x128xf32>
    %11 = vector.broadcast %10 : vector<1x128xf32> to vector<8x128xf32>
    %12 = arith.subf %6, %11 : vector<8x128xf32>
    %13 = arith.mulf %12, %12 : vector<8x128xf32>
    %cst_7 = arith.constant dense<0.000000e+00> : vector<128xf32>
    %14 = vector.multi_reduction <add>, %13, %cst_7 [0] : vector<8x128xf32> to vector<128xf32>
    %15 = vector.shape_cast %14 : vector<128xf32> to vector<1x128xf32>
    %cst_8 = arith.constant 8.000000e+00 : f32
    %16 = vector.broadcast %cst_8 : f32 to vector<1x128xf32>
    %17 = arith.divf %15, %16 : vector<1x128xf32>
    %18 = vector.broadcast %10 : vector<1x128xf32> to vector<8x128xf32>
    %19 = arith.subf %6, %18 : vector<8x128xf32>
    %cst_9 = arith.constant 9.99999974E-6 : f32
    %20 = vector.broadcast %cst_9 : f32 to vector<1x128xf32>
    %21 = arith.addf %17, %20 : vector<1x128xf32>
    %22 = math.rsqrt %21 : vector<1x128xf32>
    %23 = vector.broadcast %22 : vector<1x128xf32> to vector<8x128xf32>
    %24 = arith.mulf %19, %23 : vector<8x128xf32>
    %25 = vector.extract_strided_slice %1 {offsets = [1, 0], sizes = [1, 128], strides = [1, 1]} : vector<8x128xf32> to vector<1x128xf32>
    %26 = vector.broadcast %25 : vector<1x128xf32> to vector<8x128xf32>
    %27 = arith.mulf %24, %26 : vector<8x128xf32>
    %28 = vector.extract_strided_slice %1 {offsets = [2, 0], sizes = [1, 128], strides = [1, 1]} : vector<8x128xf32> to vector<1x128xf32>
    %29 = vector.broadcast %28 : vector<1x128xf32> to vector<8x128xf32>
    %30 = arith.addf %27, %29 : vector<8x128xf32>
    %cst_10 = arith.constant 0.000000e+00 : f32
    %31 = vector.broadcast %cst_10 : f32 to vector<8x128xf32>
    %32 = arith.maximumf %30, %31 : vector<8x128xf32>
    %c0_11 = arith.constant 0 : index
    %c0_12 = arith.constant 0 : index
    %33 = vector.load %arg4[%c0_11, %c0_12] : memref<8x128xf32, #tpu.memory_space<vmem>>, vector<8x128xf32>
    %c0_13 = arith.constant 0 : index
    %c0_14 = arith.constant 0 : index
    %34 = vector.load %arg3[%c0_13, %c0_14] : memref<128x128xf32, #tpu.memory_space<vmem>>, vector<128x128xf32>
    %cst_15 = arith.constant dense<0.000000e+00> : vector<8x128xf32>
    %35 = tpu.matmul %32, %34, %cst_15 {dimension_numbers = #tpu.dot_dimension_numbers<[1], [0], [0], [1], [0, 0, 1, 1], [], []>, precision = #tpu.contract_precision<fp32>} : vector<8x128xf32>, vector<128x128xf32>, vector<8x128xf32> -> vector<8x128xf32>
    %36 = vector.extract_strided_slice %33 {offsets = [0, 0], sizes = [1, 128], strides = [1, 1]} : vector<8x128xf32> to vector<1x128xf32>
    %37 = vector.broadcast %36 : vector<1x128xf32> to vector<8x128xf32>
    %38 = arith.addf %35, %37 : vector<8x128xf32>
    %cst_16 = arith.constant dense<0.000000e+00> : vector<128xf32>
    %39 = vector.multi_reduction <add>, %38, %cst_16 [0] : vector<8x128xf32> to vector<128xf32>
    %40 = vector.shape_cast %39 : vector<128xf32> to vector<1x128xf32>
    %cst_17 = arith.constant 8.000000e+00 : f32
    %41 = vector.broadcast %cst_17 : f32 to vector<1x128xf32>
    %42 = arith.divf %40, %41 : vector<1x128xf32>
    %43 = vector.broadcast %42 : vector<1x128xf32> to vector<8x128xf32>
    %44 = arith.subf %38, %43 : vector<8x128xf32>
    %45 = arith.mulf %44, %44 : vector<8x128xf32>
    %cst_18 = arith.constant dense<0.000000e+00> : vector<128xf32>
    %46 = vector.multi_reduction <add>, %45, %cst_18 [0] : vector<8x128xf32> to vector<128xf32>
    %47 = vector.shape_cast %46 : vector<128xf32> to vector<1x128xf32>
    %cst_19 = arith.constant 8.000000e+00 : f32
    %48 = vector.broadcast %cst_19 : f32 to vector<1x128xf32>
    %49 = arith.divf %47, %48 : vector<1x128xf32>
    %50 = vector.broadcast %42 : vector<1x128xf32> to vector<8x128xf32>
    %51 = arith.subf %38, %50 : vector<8x128xf32>
    %cst_20 = arith.constant 9.99999974E-6 : f32
    %52 = vector.broadcast %cst_20 : f32 to vector<1x128xf32>
    %53 = arith.addf %49, %52 : vector<1x128xf32>
    %54 = math.rsqrt %53 : vector<1x128xf32>
    %55 = vector.broadcast %54 : vector<1x128xf32> to vector<8x128xf32>
    %56 = arith.mulf %51, %55 : vector<8x128xf32>
    %57 = vector.extract_strided_slice %33 {offsets = [1, 0], sizes = [1, 128], strides = [1, 1]} : vector<8x128xf32> to vector<1x128xf32>
    %58 = vector.broadcast %57 : vector<1x128xf32> to vector<8x128xf32>
    %59 = arith.mulf %56, %58 : vector<8x128xf32>
    %60 = vector.extract_strided_slice %33 {offsets = [2, 0], sizes = [1, 128], strides = [1, 1]} : vector<8x128xf32> to vector<1x128xf32>
    %61 = vector.broadcast %60 : vector<1x128xf32> to vector<8x128xf32>
    %62 = arith.addf %59, %61 : vector<8x128xf32>
    %cst_21 = arith.constant 0.000000e+00 : f32
    %63 = vector.broadcast %cst_21 : f32 to vector<8x128xf32>
    %64 = arith.maximumf %62, %63 : vector<8x128xf32>
    %c0_22 = arith.constant 0 : index
    %c0_23 = arith.constant 0 : index
    %65 = vector.load %arg6[%c0_22, %c0_23] : memref<8x128xf32, #tpu.memory_space<vmem>>, vector<8x128xf32>
    %c0_24 = arith.constant 0 : index
    %c0_25 = arith.constant 0 : index
    %66 = vector.load %arg5[%c0_24, %c0_25] : memref<128x128xf32, #tpu.memory_space<vmem>>, vector<128x128xf32>
    %cst_26 = arith.constant dense<0.000000e+00> : vector<8x128xf32>
    %67 = tpu.matmul %64, %66, %cst_26 {dimension_numbers = #tpu.dot_dimension_numbers<[1], [0], [0], [1], [0, 0, 1, 1], [], []>, precision = #tpu.contract_precision<fp32>} : vector<8x128xf32>, vector<128x128xf32>, vector<8x128xf32> -> vector<8x128xf32>
    %68 = vector.extract_strided_slice %65 {offsets = [0, 0], sizes = [1, 128], strides = [1, 1]} : vector<8x128xf32> to vector<1x128xf32>
    %69 = vector.broadcast %68 : vector<1x128xf32> to vector<8x128xf32>
    %70 = arith.addf %67, %69 : vector<8x128xf32>
    %cst_27 = arith.constant dense<0.000000e+00> : vector<128xf32>
    %71 = vector.multi_reduction <add>, %70, %cst_27 [0] : vector<8x128xf32> to vector<128xf32>
    %72 = vector.shape_cast %71 : vector<128xf32> to vector<1x128xf32>
    %cst_28 = arith.constant 8.000000e+00 : f32
    %73 = vector.broadcast %cst_28 : f32 to vector<1x128xf32>
    %74 = arith.divf %72, %73 : vector<1x128xf32>
    %75 = vector.broadcast %74 : vector<1x128xf32> to vector<8x128xf32>
    %76 = arith.subf %70, %75 : vector<8x128xf32>
    %77 = arith.mulf %76, %76 : vector<8x128xf32>
    %cst_29 = arith.constant dense<0.000000e+00> : vector<128xf32>
    %78 = vector.multi_reduction <add>, %77, %cst_29 [0] : vector<8x128xf32> to vector<128xf32>
    %79 = vector.shape_cast %78 : vector<128xf32> to vector<1x128xf32>
    %cst_30 = arith.constant 8.000000e+00 : f32
    %80 = vector.broadcast %cst_30 : f32 to vector<1x128xf32>
    %81 = arith.divf %79, %80 : vector<1x128xf32>
    %82 = vector.broadcast %74 : vector<1x128xf32> to vector<8x128xf32>
    %83 = arith.subf %70, %82 : vector<8x128xf32>
    %cst_31 = arith.constant 9.99999974E-6 : f32
    %84 = vector.broadcast %cst_31 : f32 to vector<1x128xf32>
    %85 = arith.addf %81, %84 : vector<1x128xf32>
    %86 = math.rsqrt %85 : vector<1x128xf32>
    %87 = vector.broadcast %86 : vector<1x128xf32> to vector<8x128xf32>
    %88 = arith.mulf %83, %87 : vector<8x128xf32>
    %89 = vector.extract_strided_slice %65 {offsets = [1, 0], sizes = [1, 128], strides = [1, 1]} : vector<8x128xf32> to vector<1x128xf32>
    %90 = vector.broadcast %89 : vector<1x128xf32> to vector<8x128xf32>
    %91 = arith.mulf %88, %90 : vector<8x128xf32>
    %92 = vector.extract_strided_slice %65 {offsets = [2, 0], sizes = [1, 128], strides = [1, 1]} : vector<8x128xf32> to vector<1x128xf32>
    %93 = vector.broadcast %92 : vector<1x128xf32> to vector<8x128xf32>
    %94 = arith.addf %91, %93 : vector<8x128xf32>
    %cst_32 = arith.constant 0.000000e+00 : f32
    %95 = vector.broadcast %cst_32 : f32 to vector<8x128xf32>
    %96 = arith.maximumf %94, %95 : vector<8x128xf32>
    %c0_33 = arith.constant 0 : index
    %c0_34 = arith.constant 0 : index
    %97 = vector.load %arg8[%c0_33, %c0_34] : memref<8x128xf32, #tpu.memory_space<vmem>>, vector<8x128xf32>
    %c0_35 = arith.constant 0 : index
    %c0_36 = arith.constant 0 : index
    %98 = vector.load %arg7[%c0_35, %c0_36] : memref<128x128xf32, #tpu.memory_space<vmem>>, vector<128x128xf32>
    %cst_37 = arith.constant dense<0.000000e+00> : vector<8x128xf32>
    %99 = tpu.matmul %96, %98, %cst_37 {dimension_numbers = #tpu.dot_dimension_numbers<[1], [0], [0], [1], [0, 0, 1, 1], [], []>, precision = #tpu.contract_precision<fp32>} : vector<8x128xf32>, vector<128x128xf32>, vector<8x128xf32> -> vector<8x128xf32>
    %100 = vector.extract_strided_slice %97 {offsets = [0, 0], sizes = [1, 128], strides = [1, 1]} : vector<8x128xf32> to vector<1x128xf32>
    %101 = vector.broadcast %100 : vector<1x128xf32> to vector<8x128xf32>
    %102 = arith.addf %99, %101 : vector<8x128xf32>
    %cst_38 = arith.constant dense<0.000000e+00> : vector<128xf32>
    %103 = vector.multi_reduction <add>, %102, %cst_38 [0] : vector<8x128xf32> to vector<128xf32>
    %104 = vector.shape_cast %103 : vector<128xf32> to vector<1x128xf32>
    %cst_39 = arith.constant 8.000000e+00 : f32
    %105 = vector.broadcast %cst_39 : f32 to vector<1x128xf32>
    %106 = arith.divf %104, %105 : vector<1x128xf32>
    %107 = vector.broadcast %106 : vector<1x128xf32> to vector<8x128xf32>
    %108 = arith.subf %102, %107 : vector<8x128xf32>
    %109 = arith.mulf %108, %108 : vector<8x128xf32>
    %cst_40 = arith.constant dense<0.000000e+00> : vector<128xf32>
    %110 = vector.multi_reduction <add>, %109, %cst_40 [0] : vector<8x128xf32> to vector<128xf32>
    %111 = vector.shape_cast %110 : vector<128xf32> to vector<1x128xf32>
    %cst_41 = arith.constant 8.000000e+00 : f32
    %112 = vector.broadcast %cst_41 : f32 to vector<1x128xf32>
    %113 = arith.divf %111, %112 : vector<1x128xf32>
    %114 = vector.broadcast %106 : vector<1x128xf32> to vector<8x128xf32>
    %115 = arith.subf %102, %114 : vector<8x128xf32>
    %cst_42 = arith.constant 9.99999974E-6 : f32
    %116 = vector.broadcast %cst_42 : f32 to vector<1x128xf32>
    %117 = arith.addf %113, %116 : vector<1x128xf32>
    %118 = math.rsqrt %117 : vector<1x128xf32>
    %119 = vector.broadcast %118 : vector<1x128xf32> to vector<8x128xf32>
    %120 = arith.mulf %115, %119 : vector<8x128xf32>
    %121 = vector.extract_strided_slice %97 {offsets = [1, 0], sizes = [1, 128], strides = [1, 1]} : vector<8x128xf32> to vector<1x128xf32>
    %122 = vector.broadcast %121 : vector<1x128xf32> to vector<8x128xf32>
    %123 = arith.mulf %120, %122 : vector<8x128xf32>
    %124 = vector.extract_strided_slice %97 {offsets = [2, 0], sizes = [1, 128], strides = [1, 1]} : vector<8x128xf32> to vector<1x128xf32>
    %125 = vector.broadcast %124 : vector<1x128xf32> to vector<8x128xf32>
    %126 = arith.addf %123, %125 : vector<8x128xf32>
    %cst_43 = arith.constant 0.000000e+00 : f32
    %127 = vector.broadcast %cst_43 : f32 to vector<8x128xf32>
    %128 = arith.maximumf %126, %127 : vector<8x128xf32>
    %c0_44 = arith.constant 0 : index
    %c0_45 = arith.constant 0 : index
    %129 = vector.load %arg9[%c0_44, %c0_45] : memref<8x128xf32, #tpu.memory_space<vmem>>, vector<8x128xf32>
    tpu.vector_store %arg9[%c0_44, %c0_45], %128 {strides = array<i32>} : memref<8x128xf32, #tpu.memory_space<vmem>>, vector<8x128xf32>,
    return
  }
}

</mosaic_0001>

<bundles_post_ra>
// kernel: _lambda_.1
= control target key start
LH: loop header
LB: loop body
LE: loop exit
PB: predicated region body
PF: predicated region fallthrough
CT: control target
= control target key end

     0   :  { %14 = vsyncpa [#allocation3], 0  ;;  %s6184_s0 = inlined_call_operand.vmem [shape: f32[8,128], index: 0, kind: input, shape index: {}]   ;;  %s6185_s1 = inlined_call_operand.hbm [shape: f32[128,128], index: 1, kind: input, shape index: {}]   ;;  %s6186_s2 = inlined_call_operand.hbm [shape: f32[8,128], index: 2, kind: input, shape index: {}]   ;;  %s6187_s3 = inlined_call_operand.hbm [shape: f32[128,128], index: 3, kind: input, shape index: {}]   ;;  %s6188_s4 = inlined_call_operand.vmem [shape: f32[8,128], index: 4, kind: input, shape index: {}]   ;;  %s6189_s5 = inlined_call_operand.hbm [shape: f32[128,128], index: 5, kind: input, shape index: {}]   ;;  %s6190_s6 = inlined_call_operand.vmem [shape: f32[8,128], index: 6, kind: input, shape index: {}]   ;;  %s6191_s7 = inlined_call_operand.hbm [shape: f32[128,128], index: 7, kind: input, shape index: {}]   ;;  %s6192_s8 = inlined_call_operand.vmem [shape: f32[8,128], index: 8, kind: input, shape index: {}]   ;;  %s6193_s9 = inlined_call_operand.hbm [shape: f32[8,128], index: 9, kind: output, shape index: {}]  }
   0x1   :  { %15 = vsyncpa [#allocation6], 0 }
   0x2   :  { %16 = vsyncpa [#allocation9], 0 }
   0x3   :  { %17 = vsyncpa [#allocation4], 0  ;;  %s4914_s30 = smov [#allocation5]   ;;  %s4774_s13 = scalar_lea.hbm %s6186_s2, 128 }
   0x4   :  { %s38_s10 = sshll.u32 %s4914_s30, 4  ;;  %p4775_p0 = scmp.ne.s32.totalorder %s6186_s2, %s4774_s13  ;;  %s39_s10 = int_to_ptr.vmem [resolvable:$true] %s38_s10 }
   0x5   :  { %p4778_p1 = scmp.lt.u32.totalorder %s4774_s13, %s6186_s2 }
   0x7   :  { %p4780_p2 = pnand %p4778_p1, %p4775_p0 }
   0x9   :  { %4783 = shalt.err (!%p4780_p2)
}
   0xa   :  { %s4784_s18 = scalar_lea.vmem %s39_s10, 128  ;;  %p4789_p4 = scmp.lt.s32.totalorder %s39_s10, %s39_s10 }
   0xb   :  { %p4785_p3 = scmp.ne.s32.totalorder %s39_s10, %s4784_s18  ;;  %p4790_p5 = scmp.lt.s32.totalorder %s4784_s18, %s4784_s18 }
   0xd   :  { %p4791_p6 = por %p4790_p5, %p4789_p4 }
   0xf   :  { %p4792_p7 = pnand %p4791_p6, %p4785_p3 }
  0x11   :  { %4795 = shalt.err (!%p4792_p7)
}
  0x12   :  { %41 = dma.hbm_to_vmem [thread:$0]  %s6186_s2, 128, %s39_s10, [#allocation6]  }
  0x13   :  { %s4915_s21 = smov [#allocation8]   ;;  %s4916_s23 = smov [#allocation2]  }
  0x14   :  { %s61_s22 = sshll.u32 %s4915_s21, 4  ;;  %s25_s24 = sshll.u32 %s4916_s23, 4  ;;  %s62_s22 = int_to_ptr.vmem [resolvable:$true] %s61_s22  ;;  %s26_s24 = int_to_ptr.vmem [resolvable:$true] %s25_s24 }
  0x15   :  { %s4796_s27 = scalar_lea.hbm %s6189_s5, 2048 }
  0x16   :  { %p4797_p8 = scmp.ne.s32.totalorder %s6189_s5, %s4796_s27  ;;  %p4800_p9 = scmp.lt.u32.totalorder %s4796_s27, %s6189_s5 }
  0x18   :  { %p4802_p10 = pnand %p4800_p9, %p4797_p8 }
  0x1a   :  { %4805 = shalt.err (!%p4802_p10)
}
  0x1b   :  { %s4806_s2 = scalar_lea.vmem %s62_s22, 2048  ;;  %p4811_p12 = scmp.lt.s32.totalorder %s62_s22, %s62_s22 }
  0x1c   :  { %p4807_p11 = scmp.ne.s32.totalorder %s62_s22, %s4806_s2  ;;  %p4812_p13 = scmp.lt.s32.totalorder %s4806_s2, %s4806_s2 }
  0x1e   :  { %p4813_p0 = por %p4812_p13, %p4811_p12 }
  0x20   :  { %p4814_p1 = pnand %p4813_p0, %p4807_p11 }
  0x22   :  { %4817 = shalt.err (!%p4814_p1)
}
  0x23   :  { %s4917_s10 = smov 128   ;;  %s4918_s12 = smov 8  }
  0x24   :  { %67 = dma.hbm_to_vmem [thread:$0]  %s6189_s5, 2048, %s62_s22, [#allocation9], %s4917_s10, %s4917_s10, %s4918_s12  }
  0x25   :  { %s4818_s17 = scalar_lea.hbm %s6185_s1, 2048 }
  0x26   :  { %p4819_p2 = scmp.ne.s32.totalorder %s6185_s1, %s4818_s17  ;;  %p4822_p3 = scmp.lt.u32.totalorder %s4818_s17, %s6185_s1 }
  0x28   :  { %p4824_p4 = pnand %p4822_p3, %p4819_p2 }
  0x2a   :  { %4827 = shalt.err (!%p4824_p4)
}
  0x2b   :  { %s4828_s23 = scalar_lea.vmem %s26_s24, 2048  ;;  %p4833_p6 = scmp.lt.s32.totalorder %s26_s24, %s26_s24 }
  0x2c   :  { %p4829_p5 = scmp.ne.s32.totalorder %s26_s24, %s4828_s23  ;;  %p4834_p7 = scmp.lt.s32.totalorder %s4828_s23, %s4828_s23 }
  0x2e   :  { %p4835_p8 = por %p4834_p7, %p4833_p6 }
  0x30   :  { %p4836_p9 = pnand %p4835_p8, %p4829_p5 }
  0x32   :  { %4839 = shalt.err (!%p4836_p9)
}
  0x33   :  { %31 = dma.hbm_to_vmem [thread:$0]  %s6185_s1, 2048, %s26_s24, [#allocation3], %s4917_s10, %s4917_s10, %s4918_s12  }
  0x34   :  { %s4919_s25 = smov [#allocation7]   ;;  %s4920_s27 = smov [#allocation10]  }
  0x35   :  { %s47_s26 = sshll.u32 %s4919_s25, 4  ;;  %s75_s28 = sshll.u32 %s4920_s27, 4  ;;  %s48_s26 = int_to_ptr.vmem [resolvable:$true] %s47_s26  ;;  %s76_s28 = int_to_ptr.vmem [resolvable:$true] %s75_s28 }
  0x36   :  { %s4840_s11 = scalar_lea.hbm %s6187_s3, 2048 }
  0x37   :  { %p4841_p10 = scmp.ne.s32.totalorder %s6187_s3, %s4840_s11  ;;  %p4844_p11 = scmp.lt.u32.totalorder %s4840_s11, %s6187_s3 }
  0x39   :  { %p4846_p12 = pnand %p4844_p11, %p4841_p10 }
  0x3b   :  { %4849 = shalt.err (!%p4846_p12)
}
  0x3c   :  { %s4850_s1 = scalar_lea.vmem %s48_s26, 2048  ;;  %p4855_p0 = scmp.lt.s32.totalorder %s48_s26, %s48_s26 }
  0x3d   :  { %p4851_p13 = scmp.ne.s32.totalorder %s48_s26, %s4850_s1  ;;  %p4856_p1 = scmp.lt.s32.totalorder %s4850_s1, %s4850_s1 }
  0x3f   :  { %p4857_p2 = por %p4856_p1, %p4855_p0 }
  0x41   :  { %p4858_p3 = pnand %p4857_p2, %p4851_p13 }
  0x43   :  { %4861 = shalt.err (!%p4858_p3)
}
  0x44   :  { %53 = dma.hbm_to_vmem [thread:$0]  %s6187_s3, 2048, %s48_s26, [#allocation6], %s4917_s10, %s4917_s10, %s4918_s12  }
  0x45   :  { %s4862_s19 = scalar_lea.hbm %s6191_s7, 2048 }
  0x46   :  { %p4863_p4 = scmp.ne.s32.totalorder %s6191_s7, %s4862_s19  ;;  %p4866_p5 = scmp.lt.u32.totalorder %s4862_s19, %s6191_s7 }
  0x48   :  { %p4868_p6 = pnand %p4866_p5, %p4863_p4 }
  0x4a   :  { %4871 = shalt.err (!%p4868_p6)
}
  0x4b   :  { %s4872_s22 = scalar_lea.vmem %s76_s28, 2048  ;;  %p4877_p8 = scmp.lt.s32.totalorder %s76_s28, %s76_s28 }
  0x4c   :  { %p4873_p7 = scmp.ne.s32.totalorder %s76_s28, %s4872_s22  ;;  %p4878_p9 = scmp.lt.s32.totalorder %s4872_s22, %s4872_s22 }
  0x4e   :  { %p4879_p10 = por %p4878_p9, %p4877_p8 }
  0x50   :  { %p4880_p11 = pnand %p4879_p10, %p4873_p7 }
  0x52   :  { %4883 = shalt.err (!%p4880_p11)
}
  0x53   :  { %81 = dma.hbm_to_vmem [thread:$0]  %s6191_s7, 2048, %s76_s28, [#allocation9], %s4917_s10, %s4917_s10, %s4918_s12  }
  0x54   :  { %4906 = dma.done.wait [#allocation3], 2048  }
  0x55   :  { %4907 = vsyncadd [#allocation3], 4294965248 }
  0x56   :  { %4908 = dma.done.wait [#allocation6], 2176  }
  0x57   :  { %4909 = vsyncadd [#allocation6], 4294965120 }
  0x58   :  { %4910 = dma.done.wait [#allocation9], 4096  }
  0x59   :  { %4911 = vsyncadd [#allocation9], 4294963200  ;;  %v4921_v0 = vmov 0.0|0.0   ;;  %vm4922_vm0 = vmmov 0   ;;  %v4923_v1 = vmov 0.0   ;;  %v101_v2 = vld [vmem:[#allocation2] sm:$0xff] }
  0x5a   :  { %4135 = vmatprep.subr.bf16.mxu0 %v4921_v0  ;;  %3327 = vmatprep.mubr.msk.f32.mxu0 %vm4922_vm0, %v4923_v1  ;;  %v102_v3 = vld [vmem:[#allocation2 + $0x8] sm:$0xff]  ;;  %v103_v4 = vld [vmem:[#allocation2 + $0x10] sm:$0xff]  ;;  %v122_v5 = vand.u32 4294901760, %v101_v2  ;;  %v104_v7 = vld [vmem:[#allocation2 + $0x18] sm:$0xff] }
  0x5b   :  { %4279 = vmatprep.subr.bf16.mxu1 %v4921_v0  ;;  %3537 = vmatprep.mubr.msk.f32.mxu1 %vm4922_vm0, %v4923_v1  ;;  %v125_v6 = vand.u32 4294901760, %v102_v3  ;;  %v128_v8 = vand.u32 4294901760, %v103_v4  ;;  %v131_v9 = vand.u32 4294901760, %v104_v7  ;;  %v105_v10 = vld [vmem:[#allocation2 + $0x20] sm:$0xff]  ;;  %v106_v11 = vld [vmem:[#allocation2 + $0x28] sm:$0xff]  ;;  %v107_v16 = vld [vmem:[#allocation2 + $0x30] sm:$0xff] }
  0x5c   :  { %v134_v14 = vand.u32 4294901760, %v105_v10  ;;  %v137_v15 = vand.u32 4294901760, %v106_v11  ;;  %v108_v17 = vld [vmem:[#allocation2 + $0x38] sm:$0xff]  ;;  %v140_v19 = vand.u32 4294901760, %v107_v16  ;;  %v109_v21 = vld [vmem:[#allocation2 + $0x40] sm:$0xff]  ;;  %v110_v22 = vld [vmem:[#allocation2 + $0x48] sm:$0xff]  ;;  %v5066_v24 = vsub.f32 %v101_v2, %v122_v5 }
  0x5d   :  { %v5053_v12 = vpack.c.bf16 %v125_v6, %v122_v5  ;;  %v5056_v13 = vpack.c.bf16 %v131_v9, %v128_v8  ;;  %v143_v20 = vand.u32 4294901760, %v108_v17  ;;  %v99_v23 = vld [vmem:[%s6184_s0] sm:$0xff]  ;;  %v5068_v25 = vsub.f32 %v102_v3, %v125_v6  ;;  %v111_v29 = vld [vmem:[#allocation2 + $0x50] sm:$0xff]  ;;  %v113_v32 = vld [vmem:[#allocation2 + $0x60] sm:$0xff] }
  0x5e   :  { %v5060_v18 = vpack.c.bf16 %v137_v15, %v134_v14  ;;  %v146_v27 = vand.u32 4294901760, %v109_v21  ;;  %v149_v28 = vand.u32 4294901760, %v110_v22  ;;  %v112_v30 = vld [vmem:[#allocation2 + $0x58] sm:$0xff]  ;;  %v5074_v31 = vand.u32 4294901760, %v99_v23  ;;  %v114_v35 = vld [vmem:[#allocation2 + $0x68] sm:$0xff]  ;;  %v115_v36 = vld [vmem:[#allocation2 + $0x70] sm:$0xff] }
  0x5f   :  { %4137 = vmatpush3.bf16.msra.mxu0 %v5053_v12  ;;  %v5071_v26 = vpack.c.bf16 %v143_v20, %v140_v19  ;;  %v5076_v33 = vsub.f32 %v103_v4, %v128_v8  ;;  %v152_v34 = vand.u32 4294901760, %v111_v29  ;;  %v116_v37 = vld [vmem:[#allocation2 + $0x78] sm:$0xff]  ;;  %v155_v39 = vand.u32 4294901760, %v112_v30 }
  0x60   :  { %4138 = vmatprep.subr.bf16.mxu0 %v4921_v0  ;;  %v5079_v38 = vpack.c.bf16 %v149_v28, %v146_v27  ;;  %v215_v40 = vand.u32 4294901760, %v5066_v24  ;;  %v222_v41 = vand.u32 4294901760, %v5068_v25  ;;  %v5083_v42 = vsub.f32 %v104_v7, %v131_v9 }
  0x61   :  { %v5085_v43 = vsub.f32 %v105_v10, %v134_v14  ;;  %v5087_v44 = vsub.f32 %v106_v11, %v137_v15  ;;  %v5091_v45 = vsub.f32 %v99_v23, %v5074_v31  ;;  %v158_v46 = vand.u32 4294901760, %v113_v32 }
  0x62   :  { %v161_v47 = vand.u32 4294901760, %v114_v35  ;;  %v164_v48 = vand.u32 4294901760, %v115_v36  ;;  %v167_v49 = vand.u32 4294901760, %v116_v37  ;;  %v5093_v50 = vsub.f32 %v107_v16, %v140_v19 }
  0x63   :  { %4140 = vmatpush3.bf16.msra.mxu0 %v5056_v13  ;;  %v5095_v51 = vsub.f32 %v108_v17, %v143_v20  ;;  %v5097_v52 = vsub.f32 %v109_v21, %v146_v27  ;;  %v229_v53 = vand.u32 4294901760, %v5076_v33  ;;  %v5101_v54 = vsub.f32 %v110_v22, %v149_v28 }
  0x64   :  { %4141 = vmatprep.subr.bf16.mxu0 %v4921_v0  ;;  %v5103_v55 = vpack.c.bf16 %v155_v39, %v152_v34  ;;  %v216_v56 = vsub.f32 %v5066_v24, %v215_v40  ;;  %v223_v57 = vsub.f32 %v5068_v25, %v222_v41  ;;  %v5108_v58 = vsub.f32 %v111_v29, %v152_v34 }
  0x65   :  { %v5110_v59 = vsub.f32 %v112_v30, %v155_v39  ;;  %v5112_v60 = vsub.f32 %v113_v32, %v158_v46  ;;  %v204_v61 = vand.u32 4294901760, %v5091_v45  ;;  %v5115_v62 = vpack.c.bf16 %v161_v47, %v158_v46 }
  0x66   :  { %v5117_v63 = vsub.f32 %v114_v35, %v161_v47  ;;  %v5119_v2 = vpack.c.bf16 %v167_v49, %v164_v48  ;;  %v5121_v3 = vsub.f32 %v115_v36, %v164_v48  ;;  %v5123_v4 = vsub.f32 %v116_v37, %v167_v49 }
  0x67   :  { %4143 = vmatpush3.bf16.msra.mxu0 %v5060_v18  ;;  %v230_v5 = vsub.f32 %v5076_v33, %v229_v53  ;;  %v236_v6 = vand.u32 4294901760, %v5083_v42  ;;  %v243_v7 = vand.u32 4294901760, %v5085_v43  ;;  %v217_v8 = vand.u32 4294901760, %v216_v56 }
  0x68   :  { %4144 = vmatprep.subr.bf16.mxu0 %v4921_v0  ;;  %v224_v9 = vand.u32 4294901760, %v223_v57  ;;  %v250_v10 = vand.u32 4294901760, %v5087_v44  ;;  %v257_v11 = vand.u32 4294901760, %v5093_v50  ;;  %v205_v14 = vsub.f32 %v5091_v45, %v204_v61 }
  0x69   :  { %v264_v15 = vand.u32 4294901760, %v5095_v51  ;;  %v271_v16 = vand.u32 4294901760, %v5097_v52  ;;  %v278_v17 = vand.u32 4294901760, %v5101_v54  ;;  %v285_v19 = vand.u32 4294901760, %v5108_v58 }
  0x6a   :  { %v292_v20 = vand.u32 4294901760, %v5110_v59  ;;  %v299_v21 = vand.u32 4294901760, %v5112_v60  ;;  %v306_v22 = vand.u32 4294901760, %v5117_v63  ;;  %v313_v23 = vand.u32 4294901760, %v5121_v3 }
  0x6b   :  { %4146 = vmatpush3.bf16.msra.mxu0 %v5071_v26  ;;  %v320_v27 = vand.u32 4294901760, %v5123_v4  ;;  %v5144_v28 = vpack.c.bf16 %v222_v41, %v215_v40  ;;  %v5146_v29 = vpack.c.bf16 %v236_v6, %v229_v53  ;;  %v237_v30 = vsub.f32 %v5083_v42, %v236_v6 }
  0x6c   :  { %4147 = vmatprep.subr.bf16.mxu0 %v4921_v0  ;;  %v5150_v32 = vpack.c.bf16 %v250_v10, %v243_v7  ;;  %v5152_v34 = vpack.c.bf16 %v264_v15, %v257_v11  ;;  %v5154_v35 = vpack.c.bf16 %v278_v17, %v271_v16  ;;  %v5157_v36 = vpack.c.bf16 %v292_v20, %v285_v19 }
  0x6d   :  { %v5159_v37 = vpack.c.bf16 %v306_v22, %v299_v21  ;;  %v5161_v39 = vpack.c.bf16 %v320_v27, %v313_v23  ;;  %v206_v40 = vand.u32 4294901760, %v205_v14  ;;  %v231_v41 = vand.u32 4294901760, %v230_v5 }
  0x6e   :  { %v4160_v46 = vpack.c.bf16 %v224_v9, %v217_v8  ;;  %v238_v47 = vand.u32 4294901760, %v237_v30  ;;  %v244_v48 = vsub.f32 %v5085_v43, %v243_v7  ;;  %v251_v49 = vsub.f32 %v5087_v44, %v250_v10 }
  0x6f   :  { %4149 = vmatpush3.bf16.msra.mxu0 %v5079_v38  ;;  %v258_v53 = vsub.f32 %v5093_v50, %v257_v11  ;;  %v265_v14 = vsub.f32 %v5095_v51, %v264_v15  ;;  %v272_v5 = vsub.f32 %v5097_v52, %v271_v16  ;;  %v279_v10 = vsub.f32 %v5101_v54, %v278_v17 }
  0x70   :  { %4150 = vmatprep.subr.bf16.mxu0 %v4921_v0  ;;  %v4163_v56 = vpack.c.bf16 %v238_v47, %v231_v41  ;;  %v245_v57 = vand.u32 4294901760, %v244_v48  ;;  %v252_v6 = vand.u32 4294901760, %v251_v49  ;;  %v286_v15 = vsub.f32 %v5108_v58, %v285_v19 }
  0x71   :  { %v259_v8 = vand.u32 4294901760, %v258_v53  ;;  %v266_v9 = vand.u32 4294901760, %v265_v14  ;;  %v273_v11 = vand.u32 4294901760, %v272_v5  ;;  %v293_v41 = vsub.f32 %v5110_v59, %v292_v20  ;;  %v806_v5 = vld [vmem:[#allocation7 + $0x60] sm:$0xff] }
  0x72   :  { %v4166_v7 = vpack.c.bf16 %v252_v6, %v245_v57  ;;  %v300_v16 = vsub.f32 %v5112_v60, %v299_v21  ;;  %v287_v47 = vand.u32 4294901760, %v286_v15  ;;  %v307_v17 = vsub.f32 %v5117_v63, %v306_v22  ;;  %v808_v15 = vld [vmem:[#allocation7 + $0x70] sm:$0xff] }
  0x73   :  { %4152 = vmatpush3.bf16.msra.mxu0 %v5103_v55  ;;  %v4169_v30 = vpack.c.bf16 %v266_v9, %v259_v8  ;;  %v294_v48 = vand.u32 4294901760, %v293_v41  ;;  %v314_v19 = vsub.f32 %v5121_v3, %v313_v23  ;;  %v321_v20 = vsub.f32 %v5123_v4, %v320_v27 }
  0x74   :  { %4153 = vmatprep.subr.bf16.mxu0 %v4921_v0  ;;  %v301_v49 = vand.u32 4294901760, %v300_v16  ;;  %v4184_v14 = vpack.c.bf16 %v5068_v25, %v5066_v24  ;;  %v4187_v23 = vpack.c.bf16 %v5083_v42, %v5076_v33  ;;  %v4190_v27 = vpack.c.bf16 %v5087_v44, %v5085_v43  ;;  %v796_v44 = vld [vmem:[#allocation7 + $0x10] sm:$0xff] }
  0x75   :  { %v4175_v53 = vpack.c.bf16 %v294_v48, %v287_v47  ;;  %v315_v57 = vand.u32 4294901760, %v314_v19  ;;  %v322_v6 = vand.u32 4294901760, %v321_v20  ;;  %v4193_v24 = vpack.c.bf16 %v5095_v51, %v5093_v50  ;;  %v809_v48 = vld [vmem:[#allocation7 + $0x78] sm:$0xff] }
  0x76   :  { %v4196_v25 = vpack.c.bf16 %v5101_v54, %v5097_v52  ;;  %v4199_v33 = vpack.c.bf16 %v5110_v59, %v5108_v58  ;;  %v4202_v42 = vpack.c.bf16 %v5117_v63, %v5112_v60  ;;  %v4205_v43 = vpack.c.bf16 %v5123_v4, %v5121_v3  ;;  %v799_v54 = vld [vmem:[#allocation7 + $0x28] sm:$0xff]  ;;  %v800_v60 = vld [vmem:[#allocation7 + $0x30] sm:$0xff]  ;;  %v802_v3 = vld [vmem:[#allocation7 + $0x40] sm:$0xff] }
  0x77   :  { %4155 = vmatpush3.bf16.msra.mxu0 %v5115_v62  ;;  %v4181_v22 = vpack.c.bf16 %v322_v6, %v315_v57  ;;  %v821_v50 = vand.u32 4294901760, %v796_v44  ;;  %v830_v58 = vand.u32 4294901760, %v799_v54  ;;  %v803_v4 = vld [vmem:[#allocation7 + $0x48] sm:$0xff]  ;;  %v851_v8 = vand.u32 4294901760, %v806_v5 }
  0x78   :  { %4156 = vmatprep.subr.bf16.mxu0 %v4921_v0  ;;  %v857_v57 = vand.u32 4294901760, %v808_v15  ;;  %v860_v6 = vand.u32 4294901760, %v809_v48 }
  0x79   :  { %v5309_v16 = vsub.f32 %v799_v54, %v830_v58  ;;  %v5325_v20 = vsub.f32 %v806_v5, %v851_v8 }
  0x7b   :  { %4158 = vmatpush3.bf16.msra.mxu0 %v5119_v2 }
  0x7c   :  { %4159 = vmatprep.subr.bf16.mxu0 %v4921_v0 }
  0x7e   :  { %3328 = vmatmul.mubr.f32.vlgmr.msra.gmra.mrb[0].mxu0 %v206_v40  ;;  %v280_v40 = vand.u32 4294901760, %v279_v10 }
  0x7f   :  { %4161 = vmatpush3.bf16.msra.mxu0 %v4160_v46  ;;  %3362 = vmatprep.mubr.msk.f32.mxu0 %vm4922_vm0, %v4923_v1 }
  0x80   :  { %4162 = vmatprep.subr.bf16.mxu0 %v4921_v0  ;;  %v4172_v46 = vpack.c.bf16 %v280_v40, %v273_v11 }
  0x83   :  { %4164 = vmatpush3.bf16.msra.mxu0 %v4163_v56  ;;  %v308_v56 = vand.u32 4294901760, %v307_v17 }
  0x84   :  { %4165 = vmatprep.subr.bf16.mxu0 %v4921_v0 }
  0x85   :  { %v4178_v21 = vpack.c.bf16 %v308_v56, %v301_v49 }
  0x87   :  { %4167 = vmatpush3.bf16.msra.mxu0 %v4166_v7  ;;  %v807_v7 = vld [vmem:[#allocation7 + $0x68] sm:$0xff] }
  0x88   :  { %4168 = vmatprep.subr.bf16.mxu0 %v4921_v0  ;;  %v854_v9 = vand.u32 4294901760, %v807_v7 }
  0x8a   :  { %v5323_v19 = vpack.c.bf16 %v854_v9, %v851_v8 }
  0x8b   :  { %4170 = vmatpush3.bf16.msra.mxu0 %v4169_v30  ;;  %v5303_v30 = vsub.f32 %v796_v44, %v821_v50 }
  0x8c   :  { %4171 = vmatprep.subr.bf16.mxu0 %v4921_v0 }
  0x8f   :  { %4173 = vmatpush3.bf16.msra.mxu0 %v4172_v46 }
  0x90   :  { %4174 = vmatprep.subr.bf16.mxu0 %v4921_v0 }
  0x93   :  { %4176 = vmatpush3.bf16.msra.mxu0 %v4175_v53 }
  0x94   :  { %4177 = vmatprep.subr.bf16.mxu0 %v4921_v0 }
  0x97   :  { %4179 = vmatpush3.bf16.msra.mxu0 %v4178_v21  ;;  %v5327_v21 = vsub.f32 %v807_v7, %v854_v9 }
  0x98   :  { %4180 = vmatprep.subr.bf16.mxu0 %v4921_v0 }
  0x9b   :  { %4182 = vmatpush3.bf16.msra.mxu0 %v4181_v22 }
  0x9c   :  { %4183 = vmatprep.subr.bf16.mxu0 %v4921_v0 }
  0x9e   :  { %3363 = vmatmul.mubr.f32.vlgmr.msra.gmra.mrb[0].mxu0 %v5074_v31 }
  0x9f   :  { %4185 = vmatpush3.bf16.msra.mxu0 %v4184_v14  ;;  %3397 = vmatprep.mubr.msk.f32.mxu0 %vm4922_vm0, %v4923_v1 }
  0xa0   :  { %4186 = vmatprep.subr.bf16.mxu0 %v4921_v0 }
  0xa3   :  { %4188 = vmatpush3.bf16.msra.mxu0 %v4187_v23  ;;  %v5332_v23 = vsub.f32 %v808_v15, %v857_v57 }
  0xa4   :  { %4189 = vmatprep.subr.bf16.mxu0 %v4921_v0 }
  0xa7   :  { %4191 = vmatpush3.bf16.msra.mxu0 %v4190_v27  ;;  %v5335_v27 = vpack.c.bf16 %v860_v6, %v857_v57 }
  0xa8   :  { %4192 = vmatprep.subr.bf16.mxu0 %v4921_v0 }
  0xab   :  { %4194 = vmatpush3.bf16.msra.mxu0 %v4193_v24  ;;  %v5337_v24 = vsub.f32 %v809_v48, %v860_v6 }
  0xac   :  { %4195 = vmatprep.subr.bf16.mxu0 %v4921_v0 }
  0xaf   :  { %4197 = vmatpush3.bf16.msra.mxu0 %v4196_v25 }
  0xb0   :  { %4198 = vmatprep.subr.bf16.mxu0 %v4921_v0 }
  0xb3   :  { %4200 = vmatpush3.bf16.msra.mxu0 %v4199_v33 }
  0xb4   :  { %4201 = vmatprep.subr.bf16.mxu0 %v4921_v0 }
  0xb7   :  { %4203 = vmatpush3.bf16.msra.mxu0 %v4202_v42  ;;  %v6207_v42 = vand.u32 4294901760, %v5303_v30 }
  0xb8   :  { %4204 = vmatprep.subr.bf16.mxu0 %v4921_v0 }
  0xbb   :  { %4206 = vmatpush3.bf16.msra.mxu0 %v4205_v43 }
  0xbc   :  { %4207 = vmatprep.subr.bf16.mxu0 %v4921_v0 }
  0xbe   :  { %3398 = vmatmul.mubr.f32.vlgmr.msra.gmra.mrb[0].mxu0 %v5091_v45  ;;  %v797_v45 = vld [vmem:[#allocation7 + $0x18] sm:$0xff] }
  0xbf   :  { %4209 = vmatpush3.bf16.msra.mxu0 %v5053_v12  ;;  %3432 = vmatprep.mubr.msk.f32.mxu0 %vm4922_vm0, %v4923_v1  ;;  %v824_v51 = vand.u32 4294901760, %v797_v45 }
  0xc0   :  { %4210 = vmatprep.subr.bf16.mxu0 %v4921_v0 }
  0xc1   :  { %v5279_v52 = vpack.c.bf16 %v824_v51, %v821_v50  ;;  %v5305_v40 = vsub.f32 %v797_v45, %v824_v51 }
  0xc3   :  { %4212 = vmatpush3.bf16.msra.mxu0 %v5056_v13  ;;  %v6206_v43 = vand.u32 4294901760, %v5305_v40 }
  0xc4   :  { %4213 = vmatprep.subr.bf16.mxu0 %v4921_v0 }
  0xc7   :  { %4215 = vmatpush3.bf16.msra.mxu0 %v5060_v18 }
  0xc8   :  { %4216 = vmatprep.subr.bf16.mxu0 %v4921_v0 }
  0xcb   :  { %4218 = vmatpush3.bf16.msra.mxu0 %v5071_v26 }
  0xcc   :  { %4219 = vmatprep.subr.bf16.mxu0 %v4921_v0 }
  0xcf   :  { %4221 = vmatpush3.bf16.msra.mxu0 %v5079_v38 }
  0xd0   :  { %4222 = vmatprep.subr.bf16.mxu0 %v4921_v0 }
  0xd3   :  { %4224 = vmatpush3.bf16.msra.mxu0 %v5103_v55 }
  0xd4   :  { %4225 = vmatprep.subr.bf16.mxu0 %v4921_v0 }
  0xd7   :  { %4227 = vmatpush3.bf16.msra.mxu0 %v5115_v62 }
  0xd8   :  { %4228 = vmatprep.subr.bf16.mxu0 %v4921_v0 }
  0xdb   :  { %4230 = vmatpush3.bf16.msra.mxu0 %v5119_v2 }
  0xdc   :  { %4231 = vmatprep.subr.bf16.mxu0 %v4921_v0 }
  0xde   :  { %3433 = vmatmul.mubr.f32.vlgmr.msra.gmra.mrb[0].mxu0 %v204_v61  ;;  %v801_v61 = vld [vmem:[#allocation7 + $0x38] sm:$0xff] }
  0xdf   :  { %4233 = vmatpush3.bf16.msra.mxu0 %v5144_v28  ;;  %3467 = vmatprep.mubr.msk.f32.mxu0 %vm4922_vm0, %v4923_v1  ;;  %v836_v63 = vand.u32 4294901760, %v801_v61  ;;  %v839_v28 = vand.u32 4294901760, %v802_v3 }
  0xe0   :  { %4234 = vmatprep.subr.bf16.mxu0 %v4921_v0 }
  0xe1   :  { %v5313_v47 = vsub.f32 %v801_v61, %v836_v63  ;;  %v5315_v17 = vsub.f32 %v802_v3, %v839_v28 }
  0xe3   :  { %4236 = vmatpush3.bf16.msra.mxu0 %v5146_v29  ;;  %v842_v29 = vand.u32 4294901760, %v803_v4 }
  0xe4   :  { %4237 = vmatprep.subr.bf16.mxu0 %v4921_v0 }
  0xe5   :  { %v5317_v49 = vsub.f32 %v803_v4, %v842_v29 }
  0xe7   :  { %4239 = vmatpush3.bf16.msra.mxu0 %v5150_v32  ;;  %v5291_v32 = vpack.c.bf16 %v842_v29, %v839_v28 }
  0xe8   :  { %4240 = vmatprep.subr.bf16.mxu0 %v4921_v0 }
  0xeb   :  { %4242 = vmatpush3.bf16.msra.mxu0 %v5152_v34  ;;  %v804_v34 = vld [vmem:[#allocation7 + $0x50] sm:$0xff] }
  0xec   :  { %4243 = vmatprep.subr.bf16.mxu0 %v4921_v0 }
  0xef   :  { %4245 = vmatpush3.bf16.msra.mxu0 %v5154_v35  ;;  %v805_v35 = vld [vmem:[#allocation7 + $0x58] sm:$0xff] }
  0xf0   :  { %4246 = vmatprep.subr.bf16.mxu0 %v4921_v0 }
  0xf3   :  { %4248 = vmatpush3.bf16.msra.mxu0 %v5157_v36  ;;  %v845_v36 = vand.u32 4294901760, %v804_v34 }
  0xf4   :  { %4249 = vmatprep.subr.bf16.mxu0 %v4921_v0 }
  0xf5   :  { %v5319_v53 = vsub.f32 %v804_v34, %v845_v36 }
  0xf7   :  { %4251 = vmatpush3.bf16.msra.mxu0 %v5159_v37  ;;  %v848_v37 = vand.u32 4294901760, %v805_v35  ;;  %v6199_v15 = vand.u32 4294901760, %v5319_v53 }
  0xf8   :  { %4252 = vmatprep.subr.bf16.mxu0 %v4921_v0 }
  0xf9   :  { %v5321_v56 = vsub.f32 %v805_v35, %v848_v37  ;;  %v6201_v35 = vand.u32 4294901760, %v5315_v17  ;;  %v979_v6 = vsub.f32 %v5319_v53, %v6199_v15 }
  0xfb   :  { %4254 = vmatpush3.bf16.msra.mxu0 %v5161_v39  ;;  %v5295_v39 = vpack.c.bf16 %v848_v37, %v845_v36  ;;  %v6200_v36 = vand.u32 4294901760, %v5317_v49  ;;  %v965_v5 = vsub.f32 %v5315_v17, %v6201_v35  ;;  %v6198_v48 = vand.u32 4294901760, %v5321_v56 }
  0xfc   :  { %4255 = vmatprep.subr.bf16.mxu0 %v4921_v0 }
  0xfd   :  { %v972_v7 = vsub.f32 %v5317_v49, %v6200_v36  ;;  %v966_v8 = vand.u32 4294901760, %v965_v5 }
  0xfe   :  { %3468 = vmatmul.mubr.f32.vlgmr.msra.gmra.mrb[0].mxu0 %v5074_v31 }
  0xff   :  { %4257 = vmatpush3.bf16.msra.mxu0 %v5053_v12  ;;  %3502 = vmatprep.mubr.msk.f32.mxu0 %vm4922_vm0, %v4923_v1  ;;  %v794_v12 = vld [vmem:[#allocation7] sm:$0xff]  ;;  %v973_v9 = vand.u32 4294901760, %v972_v7 }
 0x100   :  { %4258 = vmatprep.subr.bf16.mxu0 %v4921_v0 }
 0x101   :  { %v5389_v57 = vpack.c.bf16 %v973_v9, %v966_v8  ;;  %v4331_v9 = vpack.c.bf16 %v5305_v40, %v5303_v30 }
 0x103   :  { %4260 = vmatpush3.bf16.msra.mxu0 %v5056_v13  ;;  %v795_v13 = vld [vmem:[#allocation7 + $0x8] sm:$0xff] }
 0x104   :  { %4261 = vmatprep.subr.bf16.mxu0 %v4921_v0 }
 0x107   :  { %4263 = vmatpush3.bf16.msra.mxu0 %v5060_v18  ;;  %v815_v18 = vand.u32 4294901760, %v794_v12 }
 0x108   :  { %4264 = vmatprep.subr.bf16.mxu0 %v4921_v0 }
 0x109   :  { %v5299_v10 = vsub.f32 %v794_v12, %v815_v18 }
 0x10b   :  { %4266 = vmatpush3.bf16.msra.mxu0 %v5071_v26  ;;  %v818_v26 = vand.u32 4294901760, %v795_v13  ;;  %v6209_v22 = vand.u32 4294901760, %v5299_v10 }
 0x10c   :  { %4267 = vmatprep.subr.bf16.mxu0 %v4921_v0 }
 0x10d   :  { %v5301_v11 = vsub.f32 %v795_v13, %v818_v26  ;;  %v909_v25 = vsub.f32 %v5299_v10, %v6209_v22 }
 0x10f   :  { %4269 = vmatpush3.bf16.msra.mxu0 %v5079_v38  ;;  %v5275_v38 = vpack.c.bf16 %v818_v26, %v815_v18  ;;  %v6208_v14 = vand.u32 4294901760, %v5301_v11  ;;  %v910_v12 = vand.u32 4294901760, %v909_v25  ;;  %v923_v18 = vsub.f32 %v5303_v30, %v6207_v42 }
 0x110   :  { %4270 = vmatprep.subr.bf16.mxu0 %v4921_v0  ;;  %v930_v26 = vsub.f32 %v5305_v40, %v6206_v43  ;;  %v986_v25 = vsub.f32 %v5321_v56, %v6198_v48  ;;  %v4328_v8 = vpack.c.bf16 %v5301_v11, %v5299_v10 }
 0x111   :  { %4281 = vmatpush3.bf16.msra.mxu1 %v5275_v38  ;;  %v916_v33 = vsub.f32 %v5301_v11, %v6208_v14  ;;  %v924_v45 = vand.u32 4294901760, %v923_v18  ;;  %v6196_v18 = vand.u32 4294901760, %v5327_v21 }
 0x112   :  { %4282 = vmatprep.subr.bf16.mxu1 %v4921_v0  ;;  %v931_v50 = vand.u32 4294901760, %v930_v26 }
 0x113   :  { %4272 = vmatpush3.bf16.msra.mxu0 %v5103_v55  ;;  %v917_v13 = vand.u32 4294901760, %v916_v33  ;;  %v980_v33 = vand.u32 4294901760, %v979_v6 }
 0x114   :  { %4273 = vmatprep.subr.bf16.mxu0 %v4921_v0  ;;  %v5359_v54 = vpack.c.bf16 %v931_v50, %v924_v45  ;;  %v1000_v50 = vsub.f32 %v5327_v21, %v6196_v18 }
 0x115   :  { %4284 = vmatpush3.bf16.msra.mxu1 %v5279_v52  ;;  %v5355_v44 = vpack.c.bf16 %v917_v13, %v910_v12  ;;  %v987_v12 = vand.u32 4294901760, %v986_v25  ;;  %v6197_v13 = vand.u32 4294901760, %v5325_v20 }
 0x116   :  { %4285 = vmatprep.subr.bf16.mxu1 %v4921_v0 }
 0x117   :  { %4275 = vmatpush3.bf16.msra.mxu0 %v5115_v62  ;;  %v833_v62 = vand.u32 4294901760, %v800_v60  ;;  %v5399_v26 = vpack.c.bf16 %v987_v12, %v980_v33  ;;  %v993_v45 = vsub.f32 %v5325_v20, %v6197_v13  ;;  %v4340_v33 = vpack.c.bf16 %v5317_v49, %v5315_v17 }
 0x118   :  { %4276 = vmatprep.subr.bf16.mxu0 %v4921_v0  ;;  %v117_v12 = vlaneseq }
 0x119   :  { %v5311_v46 = vsub.f32 %v800_v60, %v833_v62 }
 0x11b   :  { %4278 = vmatpush3.bf16.msra.mxu0 %v5119_v2  ;;  %v5287_v2 = vpack.c.bf16 %v836_v63, %v833_v62  ;;  %v6203_v62 = vand.u32 4294901760, %v5311_v46  ;;  %v6202_v63 = vand.u32 4294901760, %v5313_v47  ;;  %v4337_v25 = vpack.c.bf16 %v5313_v47, %v5311_v46 }
 0x11c   :  { %4423 = vmatprep.subr.bf16.mxu0 %v4921_v0 }
 0x11d   :  { %v951_v4 = vsub.f32 %v5311_v46, %v6203_v62  ;;  %v958_v28 = vsub.f32 %v5313_v47, %v6202_v63 }
 0x11e   :  { %3503 = vmatmul.mubr.f32.vlgmr.msra.gmra.mrb[0].mxu0 %v5074_v31  ;;  %v798_v31 = vld [vmem:[#allocation7 + $0x20] sm:$0xff] }
 0x11f   :  { %3747 = vmatprep.mubr.msk.f32.mxu0 %vm4922_vm0, %v4923_v1  ;;  %v827_v55 = vand.u32 4294901760, %v798_v31  ;;  %v952_v29 = vand.u32 4294901760, %v951_v4  ;;  %v959_v34 = vand.u32 4294901760, %v958_v28 }
 0x121   :  { %v5283_v59 = vpack.c.bf16 %v830_v58, %v827_v55  ;;  %v5307_v41 = vsub.f32 %v798_v31, %v827_v55  ;;  %v6204_v31 = vand.u32 4294901760, %v5309_v16  ;;  %v5379_v37 = vpack.c.bf16 %v959_v34, %v952_v29 }
 0x123   :  { %4287 = vmatpush3.bf16.msra.mxu1 %v5283_v59  ;;  %v6205_v51 = vand.u32 4294901760, %v5307_v41  ;;  %v944_v58 = vsub.f32 %v5309_v16, %v6204_v31  ;;  %v4334_v6 = vpack.c.bf16 %v5309_v16, %v5307_v41 }
 0x124   :  { %4288 = vmatprep.subr.bf16.mxu1 %v4921_v0 }
 0x125   :  { %v937_v55 = vsub.f32 %v5307_v41, %v6205_v51  ;;  %v945_v61 = vand.u32 4294901760, %v944_v58  ;;  %v1001_v58 = vand.u32 4294901760, %v1000_v50  ;;  %v118_v50 = vshrl.u32 %v117_v12, 7 }
 0x127   :  { %4290 = vmatpush3.bf16.msra.mxu1 %v5287_v2  ;;  %v938_v60 = vand.u32 4294901760, %v937_v55  ;;  %v994_v55 = vand.u32 4294901760, %v993_v45  ;;  %v4343_v45 = vpack.c.bf16 %v5321_v56, %v5319_v53 }
 0x128   :  { %4291 = vmatprep.subr.bf16.mxu1 %v4921_v0 }
 0x129   :  { %v5369_v3 = vpack.c.bf16 %v945_v61, %v938_v60  ;;  %v6195_v60 = vand.u32 4294901760, %v5332_v23  ;;  %v6194_v61 = vand.u32 4294901760, %v5337_v24  ;;  %v5409_v4 = vpack.c.bf16 %v1001_v58, %v994_v55 }
 0x12a   :  { %v5433_v58 = vsub.s32 0, %v118_v50 }
 0x12b   :  { %4293 = vmatpush3.bf16.msra.mxu1 %v5291_v32  ;;  %v1007_v28 = vsub.f32 %v5332_v23, %v6195_v60  ;;  %v1014_v29 = vsub.f32 %v5337_v24, %v6194_v61 }
 0x12c   :  { %4294 = vmatprep.subr.bf16.mxu1 %v4921_v0 }
 0x12d   :  { %v1008_v34 = vand.u32 4294901760, %v1007_v28  ;;  %v1015_v5 = vand.u32 4294901760, %v1014_v29  ;;  %v100_v28 = vld [vmem:[#allocation5] sm:$0xff] }
 0x12f   :  { %4296 = vmatpush3.bf16.msra.mxu1 %v5295_v39  ;;  %v5417_v7 = vpack.c.bf16 %v1015_v5, %v1008_v34  ;;  %v120_v34 = vrot.slane %v100_v28, %v5433_v58 }
 0x130   :  { %4297 = vmatprep.subr.bf16.mxu1 %v4921_v0 }
 0x133   :  { %4299 = vmatpush3.bf16.msra.mxu1 %v5323_v19 }
 0x134   :  { %4300 = vmatprep.subr.bf16.mxu1 %v4921_v0 }
 0x137   :  { %4302 = vmatpush3.bf16.msra.mxu1 %v5335_v27 }
 0x138   :  { %4303 = vmatprep.subr.bf16.mxu1 %v4921_v0 }
 0x1f1   :  { %v758_v5 = vpop.f32.mrb[0].mxu0 }
 0x1f2   :  { %v4711_v61 = vadd.f32 %v758_v5, %v120_v34  ;;  %v3504_v60 = vpop.f32.mrb[1].mxu0  ;;  %v5438_v34 = vsub.s32 1, %v118_v50 }
 0x1f3   :  { %v5440_v60 = vsub.s32 2, %v118_v50  ;;  %v1492_v50 = vld [vmem:[#allocation8 + $0x30] sm:$0xff] }
 0x1f4   :  { %v762_v18 = vrot.slane %v4711_v61, 4 }
 0x1f6   :  { %v763_v13 = vadd.f32 %v4711_v61, %v762_v18 }
 0x1f8   :  { %v764_v48 = vrot.slane %v763_v13, 2 }
 0x1fa   :  { %v765_v15 = vadd.f32 %v764_v48, %v763_v13  ;;  %v785_v48 = vrot.slane %v100_v28, %v5438_v34 }
 0x1fc   :  { %v766_v36 = vrot.slane %v765_v15, 1 }
 0x1fe   :  { %v767_v12 = vadd.f32 %v766_v36, %v765_v15 }
 0x200   :  { %v769_v35 = vmul.f32 0.125, %v767_v12  ;;  %v1494_v12 = vld [vmem:[#allocation8 + $0x40] sm:$0xff] }
 0x202   :  { %v770_v63 = vsub.f32 %v4711_v61, %v769_v35  ;;  %v790_v35 = vrot.slane %v100_v28, %v5440_v60  ;;  %v1525_v28 = vand.u32 4294901760, %v1492_v50 }
 0x204   :  { %v771_v62 = vmul.f32 %v770_v63, %v770_v63 }
 0x206   :  { %v772_v31 = vrot.slane %v771_v62, 4 }
 0x208   :  { %v773_v51 = vadd.f32 %v772_v31, %v771_v62 }
 0x20a   :  { %v774_v43 = vrot.slane %v773_v51, 2 }
 0x20c   :  { %v775_v42 = vadd.f32 %v774_v43, %v773_v51  ;;  %v6243_v51 = vpack.c.bf16 %v5337_v24, %v5332_v23 }
 0x20e   :  { %v776_v14 = vrot.slane %v775_v42, 1 }
 0x210   :  { %v777_v22 = vadd.f32 %v776_v14, %v775_v42 }
 0x212   :  { %v778_v29 = vmul.f32 0.125, %v777_v22 }
 0x214   :  { %v779_v55 = vadd.f32 1e-05, %v778_v29 }
 0x216   :  { %4766 = vrsqrt.f32 %v779_v55  ;;  %v1493_v55 = vld [vmem:[#allocation8 + $0x38] sm:$0xff] }
 0x217   :  { %v1528_v29 = vand.u32 4294901760, %v1493_v55 }
 0x219   :  { %v5594_v5 = vpack.c.bf16 %v1528_v29, %v1525_v28 }
 0x220   :  { %v4767_v13 = vpop.eup %4766 }
 0x221   :  { %v781_v36 = vmul.f32 %v4767_v13, %v770_v63  ;;  %v6245_v63 = vand.u32 4294901760, %v5301_v11  ;;  %v6249_v11 = vand.u32 4294901760, %v5309_v16  ;;  %v6255_v16 = vand.u32 4294901760, %v5321_v56 }
 0x222   :  { %v1531_v13 = vand.u32 4294901760, %v1494_v12 }
 0x223   :  { %v786_v15 = vmul.f32 %v785_v48, %v781_v36  ;;  %v1495_v48 = vld [vmem:[#allocation8 + $0x48] sm:$0xff] }
 0x224   :  { %v1534_v36 = vand.u32 4294901760, %v1495_v48 }
 0x225   :  { %v791_v18 = vadd.f32 %v790_v35, %v786_v15  ;;  %v1496_v15 = vld [vmem:[#allocation8 + $0x50] sm:$0xff] }
 0x226   :  { %v5598_v35 = vpack.c.bf16 %v1534_v36, %v1531_v13 }
 0x227   :  { %v792_v31 = vmax.f32 %v791_v18, 0.0  ;;  %v1497_v18 = vld [vmem:[#allocation8 + $0x58] sm:$0xff] }
 0x229   :  { %v5444_v62 = vand.u32 4294901760, %v792_v31 }
 0x22b   :  { %v896_v14 = vsub.f32 %v792_v31, %v5444_v62  ;;  %v1537_v31 = vand.u32 4294901760, %v1496_v15 }
 0x22d   :  { %v897_v22 = vand.u32 4294901760, %v896_v14 }
 0x22f   :  { %v898_v42 = vsub.f32 %v896_v14, %v897_v22 }
 0x231   :  { %v899_v43 = vand.u32 4294901760, %v898_v42  ;;  %v1499_v42 = vld [vmem:[#allocation8 + $0x68] sm:$0xff] }
 0x233   :  { %3538 = vmatmul.mubr.f32.vlgmr.msra.gmra.mrb[0].mxu1 %v899_v43 }
 0x234   :  { %4305 = vmatpush3.bf16.msra.mxu1 %v5355_v44  ;;  %3572 = vmatprep.mubr.msk.f32.mxu1 %vm4922_vm0, %v4923_v1  ;;  %v6242_v44 = vpack.c.bf16 %v5327_v21, %v5325_v20 }
 0x235   :  { %4306 = vmatprep.subr.bf16.mxu1 %v4921_v0 }
 0x238   :  { %4308 = vmatpush3.bf16.msra.mxu1 %v5359_v54  ;;  %v6244_v54 = vand.u32 4294901760, %v5299_v10  ;;  %v6248_v10 = vand.u32 4294901760, %v5307_v41  ;;  %v6254_v41 = vand.u32 4294901760, %v5319_v53  ;;  %v1489_v53 = vld [vmem:[#allocation8 + $0x18] sm:$0xff] }
 0x239   :  { %4309 = vmatprep.subr.bf16.mxu1 %v4921_v0 }
 0x23a   :  { %v4382_v61 = vpack.c.bf16 %v6249_v11, %v6248_v10  ;;  %v1500_v10 = vld [vmem:[#allocation8 + $0x70] sm:$0xff]  ;;  %v1501_v11 = vld [vmem:[#allocation8 + $0x78] sm:$0xff] }
 0x23c   :  { %4311 = vmatpush3.bf16.msra.mxu1 %v5369_v3  ;;  %v4376_v3 = vpack.c.bf16 %v6245_v63, %v6244_v54 }
 0x23d   :  { %4312 = vmatprep.subr.bf16.mxu1 %v4921_v0 }
 0x240   :  { %4314 = vmatpush3.bf16.msra.mxu1 %v5379_v37  ;;  %v6246_v37 = vand.u32 4294901760, %v5303_v30  ;;  %v6251_v30 = vand.u32 4294901760, %v5313_v47  ;;  %v6257_v47 = vand.u32 4294901760, %v5327_v21  ;;  %v1490_v21 = vld [vmem:[#allocation8 + $0x20] sm:$0xff] }
 0x241   :  { %4315 = vmatprep.subr.bf16.mxu1 %v4921_v0 }
 0x244   :  { %4317 = vmatpush3.bf16.msra.mxu1 %v5389_v57  ;;  %v6247_v57 = vand.u32 4294901760, %v5305_v40 }
 0x245   :  { %4318 = vmatprep.subr.bf16.mxu1 %v4921_v0 }
 0x248   :  { %4320 = vmatpush3.bf16.msra.mxu1 %v5399_v26  ;;  %v4379_v26 = vpack.c.bf16 %v6247_v57, %v6246_v37 }
 0x249   :  { %4321 = vmatprep.subr.bf16.mxu1 %v4921_v0 }
 0x24c   :  { %4323 = vmatpush3.bf16.msra.mxu1 %v5409_v4  ;;  %v6250_v4 = vand.u32 4294901760, %v5311_v46  ;;  %v6256_v46 = vand.u32 4294901760, %v5325_v20 }
 0x24d   :  { %4324 = vmatprep.subr.bf16.mxu1 %v4921_v0 }
 0x24e   :  { %v4385_v40 = vpack.c.bf16 %v6251_v30, %v6250_v4  ;;  %v5623_v4 = vsub.f32 %v1493_v55, %v1528_v29  ;;  %v5625_v30 = vsub.f32 %v1494_v12, %v1531_v13 }
 0x250   :  { %4326 = vmatpush3.bf16.msra.mxu1 %v5417_v7  ;;  %v6252_v7 = vand.u32 4294901760, %v5315_v17  ;;  %v6258_v17 = vand.u32 4294901760, %v5332_v23  ;;  %v1491_v23 = vld [vmem:[#allocation8 + $0x28] sm:$0xff]  ;;  %v6218_v13 = vand.u32 4294901760, %v5623_v4 }
 0x251   :  { %4327 = vmatprep.subr.bf16.mxu1 %v4921_v0 }
 0x253   :  { %3573 = vmatmul.mubr.f32.vlgmr.msra.gmra.mrb[0].mxu1 %v5444_v62 }
 0x254   :  { %4329 = vmatpush3.bf16.msra.mxu1 %v4328_v8  ;;  %3607 = vmatprep.mubr.msk.f32.mxu1 %vm4922_vm0, %v4923_v1  ;;  %v6253_v8 = vand.u32 4294901760, %v5317_v49  ;;  %v6259_v49 = vand.u32 4294901760, %v5337_v24  ;;  %v1522_v24 = vand.u32 4294901760, %v1491_v23 }
 0x255   :  { %4330 = vmatprep.subr.bf16.mxu1 %v4921_v0 }
 0x258   :  { %4332 = vmatpush3.bf16.msra.mxu1 %v4331_v9  ;;  %v4388_v9 = vpack.c.bf16 %v6253_v8, %v6252_v7  ;;  %v5630_v7 = vsub.f32 %v1496_v15, %v1537_v31 }
 0x259   :  { %4333 = vmatprep.subr.bf16.mxu1 %v4921_v0 }
 0x25c   :  { %4335 = vmatpush3.bf16.msra.mxu1 %v4334_v6  ;;  %v4391_v6 = vpack.c.bf16 %v6255_v16, %v6254_v41  ;;  %v1549_v16 = vand.u32 4294901760, %v1500_v10 }
 0x25d   :  { %4336 = vmatprep.subr.bf16.mxu1 %v4921_v0 }
 0x260   :  { %4338 = vmatpush3.bf16.msra.mxu1 %v4337_v25  ;;  %v4394_v25 = vpack.c.bf16 %v6257_v47, %v6256_v46 }
 0x261   :  { %4339 = vmatprep.subr.bf16.mxu1 %v4921_v0 }
 0x264   :  { %4341 = vmatpush3.bf16.msra.mxu1 %v4340_v33  ;;  %v4397_v33 = vpack.c.bf16 %v6259_v49, %v6258_v17  ;;  %v5642_v17 = vsub.f32 %v1500_v10, %v1549_v16 }
 0x265   :  { %4342 = vmatprep.subr.bf16.mxu1 %v4921_v0 }
 0x268   :  { %4344 = vmatpush3.bf16.msra.mxu1 %v4343_v45 }
 0x269   :  { %4345 = vmatprep.subr.bf16.mxu1 %v4921_v0 }
 0x26c   :  { %4347 = vmatpush3.bf16.msra.mxu1 %v6242_v44  ;;  %v1546_v44 = vand.u32 4294901760, %v1499_v42 }
 0x26d   :  { %4348 = vmatprep.subr.bf16.mxu1 %v4921_v0 }
 0x26e   :  { %v5636_v41 = vsub.f32 %v1499_v42, %v1546_v44 }
 0x270   :  { %4350 = vmatpush3.bf16.msra.mxu1 %v6243_v51 }
 0x271   :  { %4351 = vmatprep.subr.bf16.mxu1 %v4921_v0 }
 0x273   :  { %3608 = vmatmul.mubr.f32.vlgmr.msra.gmra.mrb[0].mxu1 %v896_v14 }
 0x274   :  { %4353 = vmatpush3.bf16.msra.mxu1 %v5275_v38  ;;  %3642 = vmatprep.mubr.msk.f32.mxu1 %vm4922_vm0, %v4923_v1 }
 0x275   :  { %4354 = vmatprep.subr.bf16.mxu1 %v4921_v0 }
 0x278   :  { %4356 = vmatpush3.bf16.msra.mxu1 %v5279_v52 }
 0x279   :  { %4357 = vmatprep.subr.bf16.mxu1 %v4921_v0 }
 0x27c   :  { %4359 = vmatpush3.bf16.msra.mxu1 %v5283_v59 }
 0x27d   :  { %4360 = vmatprep.subr.bf16.mxu1 %v4921_v0 }
 0x280   :  { %4362 = vmatpush3.bf16.msra.mxu1 %v5287_v2 }
 0x281   :  { %4363 = vmatprep.subr.bf16.mxu1 %v4921_v0 }
 0x284   :  { %4365 = vmatpush3.bf16.msra.mxu1 %v5291_v32 }
 0x285   :  { %4366 = vmatprep.subr.bf16.mxu1 %v4921_v0 }
 0x288   :  { %4368 = vmatpush3.bf16.msra.mxu1 %v5295_v39 }
 0x289   :  { %4369 = vmatprep.subr.bf16.mxu1 %v4921_v0 }
 0x28c   :  { %4371 = vmatpush3.bf16.msra.mxu1 %v5323_v19 }
 0x28d   :  { %4372 = vmatprep.subr.bf16.mxu1 %v4921_v0 }
 0x290   :  { %4374 = vmatpush3.bf16.msra.mxu1 %v5335_v27 }
 0x291   :  { %4375 = vmatprep.subr.bf16.mxu1 %v4921_v0 }
 0x293   :  { %3643 = vmatmul.mubr.f32.vlgmr.msra.gmra.mrb[0].mxu1 %v897_v22  ;;  %v1498_v22 = vld [vmem:[#allocation8 + $0x60] sm:$0xff] }
 0x294   :  { %4377 = vmatpush3.bf16.msra.mxu1 %v4376_v3  ;;  %3677 = vmatprep.mubr.msk.f32.mxu1 %vm4922_vm0, %v4923_v1  ;;  %v1543_v43 = vand.u32 4294901760, %v1498_v22 }
 0x295   :  { %4378 = vmatprep.subr.bf16.mxu1 %v4921_v0 }
 0x296   :  { %v5610_v63 = vpack.c.bf16 %v1546_v44, %v1543_v43 }
 0x298   :  { %4380 = vmatpush3.bf16.msra.mxu1 %v4379_v26  ;;  %v5618_v26 = vsub.f32 %v1491_v23, %v1522_v24 }
 0x299   :  { %4381 = vmatprep.subr.bf16.mxu1 %v4921_v0 }
 0x29c   :  { %4383 = vmatpush3.bf16.msra.mxu1 %v4382_v61  ;;  %v5621_v61 = vsub.f32 %v1492_v50, %v1525_v28 }
 0x29d   :  { %4384 = vmatprep.subr.bf16.mxu1 %v4921_v0 }
 0x2a0   :  { %4386 = vmatpush3.bf16.msra.mxu1 %v4385_v40  ;;  %v5627_v40 = vsub.f32 %v1495_v48, %v1534_v36  ;;  %v6219_v48 = vand.u32 4294901760, %v5621_v61 }
 0x2a1   :  { %4387 = vmatprep.subr.bf16.mxu1 %v4921_v0 }
 0x2a2   :  { %v1643_v15 = vsub.f32 %v5621_v61, %v6219_v48  ;;  %v6216_v42 = vand.u32 4294901760, %v5627_v40 }
 0x2a4   :  { %4389 = vmatpush3.bf16.msra.mxu1 %v4388_v9  ;;  %v5634_v9 = vsub.f32 %v1498_v22, %v1543_v43  ;;  %v6217_v22 = vand.u32 4294901760, %v5625_v30  ;;  %v1664_v10 = vsub.f32 %v5627_v40, %v6216_v42 }
 0x2a5   :  { %4390 = vmatprep.subr.bf16.mxu1 %v4921_v0 }
 0x2a6   :  { %v1657_v44 = vsub.f32 %v5625_v30, %v6217_v22 }
 0x2a8   :  { %4392 = vmatpush3.bf16.msra.mxu1 %v4391_v6  ;;  %v1552_v6 = vand.u32 4294901760, %v1501_v11 }
 0x2a9   :  { %4393 = vmatprep.subr.bf16.mxu1 %v4921_v0 }
 0x2aa   :  { %v5644_v49 = vsub.f32 %v1501_v11, %v1552_v6  ;;  %v1658_v11 = vand.u32 4294901760, %v1657_v44 }
 0x2ac   :  { %4395 = vmatpush3.bf16.msra.mxu1 %v4394_v25  ;;  %v5640_v25 = vpack.c.bf16 %v1552_v6, %v1549_v16  ;;  %v1665_v16 = vand.u32 4294901760, %v1664_v10  ;;  %v6215_v6 = vand.u32 4294901760, %v5630_v7 }
 0x2ad   :  { %4396 = vmatprep.subr.bf16.mxu1 %v4921_v0 }
 0x2b0   :  { %4398 = vmatpush3.bf16.msra.mxu1 %v4397_v33 }
 0x2b1   :  { %4399 = vmatprep.subr.bf16.mxu1 %v4921_v0 }
 0x2b3   :  { %3678 = vmatmul.mubr.f32.vlgmr.msra.gmra.mrb[0].mxu1 %v5444_v62 }
 0x2b4   :  { %4401 = vmatpush3.bf16.msra.mxu1 %v5275_v38  ;;  %3712 = vmatprep.mubr.msk.f32.mxu1 %vm4922_vm0, %v4923_v1  ;;  %v1486_v38 = vld [vmem:[#allocation8] sm:$0xff] }
 0x2b5   :  { %4402 = vmatprep.subr.bf16.mxu1 %v4921_v0 }
 0x2b8   :  { %4404 = vmatpush3.bf16.msra.mxu1 %v5279_v52  ;;  %v1487_v52 = vld [vmem:[#allocation8 + $0x8] sm:$0xff] }
 0x2b9   :  { %4405 = vmatprep.subr.bf16.mxu1 %v4921_v0 }
 0x2bc   :  { %4407 = vmatpush3.bf16.msra.mxu1 %v5283_v59  ;;  %v1507_v59 = vand.u32 4294901760, %v1486_v38 }
 0x2bd   :  { %4408 = vmatprep.subr.bf16.mxu1 %v4921_v0 }
 0x2be   :  { %v5606_v51 = vsub.f32 %v1486_v38, %v1507_v59 }
 0x2c0   :  { %4410 = vmatpush3.bf16.msra.mxu1 %v5287_v2  ;;  %v1510_v2 = vand.u32 4294901760, %v1487_v52  ;;  %v6225_v46 = vand.u32 4294901760, %v5606_v51 }
 0x2c1   :  { %4411 = vmatprep.subr.bf16.mxu1 %v4921_v0 }
 0x2c2   :  { %v5608_v54 = vsub.f32 %v1487_v52, %v1510_v2  ;;  %v1601_v33 = vsub.f32 %v5606_v51, %v6225_v46 }
 0x2c4   :  { %4413 = vmatpush3.bf16.msra.mxu1 %v5291_v32  ;;  %v5582_v32 = vpack.c.bf16 %v1510_v2, %v1507_v59  ;;  %v6224_v47 = vand.u32 4294901760, %v5608_v54  ;;  %v1602_v2 = vand.u32 4294901760, %v1601_v33 }
 0x2c5   :  { %4414 = vmatprep.subr.bf16.mxu1 %v4921_v0 }
 0x2c6   :  { %4425 = vmatpush3.bf16.msra.mxu0 %v5582_v32  ;;  %v1608_v38 = vsub.f32 %v5608_v54, %v6224_v47 }
 0x2c7   :  { %4426 = vmatprep.subr.bf16.mxu0 %v4921_v0 }
 0x2c8   :  { %4416 = vmatpush3.bf16.msra.mxu1 %v5295_v39  ;;  %v1488_v39 = vld [vmem:[#allocation8 + $0x10] sm:$0xff] }
 0x2c9   :  { %4417 = vmatprep.subr.bf16.mxu1 %v4921_v0  ;;  %v1513_v56 = vand.u32 4294901760, %v1488_v39 }
 0x2cb   :  { %v5612_v3 = vsub.f32 %v1488_v39, %v1513_v56  ;;  %v1609_v39 = vand.u32 4294901760, %v1608_v38  ;;  %v5696_v38 = vpack.c.bf16 %v1665_v16, %v1658_v11 }
 0x2cc   :  { %4419 = vmatpush3.bf16.msra.mxu1 %v5323_v19  ;;  %v1516_v19 = vand.u32 4294901760, %v1489_v53 }
 0x2cd   :  { %4420 = vmatprep.subr.bf16.mxu1 %v4921_v0  ;;  %v6223_v52 = vand.u32 4294901760, %v5612_v3  ;;  %v5664_v23 = vpack.c.bf16 %v1609_v39, %v1602_v2  ;;  %v1671_v2 = vsub.f32 %v5630_v7, %v6215_v6 }
 0x2ce   :  { %v5586_v20 = vpack.c.bf16 %v1516_v19, %v1513_v56  ;;  %v5614_v37 = vsub.f32 %v1489_v53, %v1516_v19 }
 0x2cf   :  { %v1615_v53 = vsub.f32 %v5612_v3, %v6223_v52 }
 0x2d0   :  { %4422 = vmatpush3.bf16.msra.mxu1 %v5335_v27  ;;  %4428 = vmatpush3.bf16.msra.mxu0 %v5586_v20  ;;  %v1519_v27 = vand.u32 4294901760, %v1490_v21  ;;  %v6222_v59 = vand.u32 4294901760, %v5614_v37 }
 0x2d1   :  { %4567 = vmatprep.subr.bf16.mxu1 %v4921_v0  ;;  %4429 = vmatprep.subr.bf16.mxu0 %v4921_v0 }
 0x2d2   :  { %v5590_v45 = vpack.c.bf16 %v1522_v24, %v1519_v27  ;;  %v5616_v57 = vsub.f32 %v1490_v21, %v1519_v27  ;;  %v1622_v56 = vsub.f32 %v5614_v37, %v6222_v59  ;;  %v6220_v21 = vand.u32 4294901760, %v5618_v26 }
 0x2d3   :  { %3713 = vmatmul.mubr.f32.vlgmr.msra.gmra.mrb[0].mxu1 %v5444_v62  ;;  %v1540_v62 = vand.u32 4294901760, %v1497_v18  ;;  %v1616_v27 = vand.u32 4294901760, %v1615_v53  ;;  %v1672_v53 = vand.u32 4294901760, %v1671_v2 }
 0x2d4   :  { %3957 = vmatprep.mubr.msk.f32.mxu1 %vm4922_vm0, %v4923_v1  ;;  %4431 = vmatpush3.bf16.msra.mxu0 %v5590_v45  ;;  %v6221_v19 = vand.u32 4294901760, %v5616_v57  ;;  %v1623_v24 = vand.u32 4294901760, %v1622_v56  ;;  %v1636_v55 = vsub.f32 %v5618_v26, %v6220_v21 }
 0x2d5   :  { %4432 = vmatprep.subr.bf16.mxu0 %v4921_v0  ;;  %v5602_v14 = vpack.c.bf16 %v1540_v62, %v1537_v31  ;;  %v5632_v8 = vsub.f32 %v1497_v18, %v1540_v62  ;;  %v1650_v18 = vsub.f32 %v5623_v4, %v6218_v13  ;;  %v1644_v31 = vand.u32 4294901760, %v1643_v15 }
 0x2d6   :  { %v1629_v50 = vsub.f32 %v5616_v57, %v6221_v19  ;;  %v5672_v28 = vpack.c.bf16 %v1623_v24, %v1616_v27  ;;  %v1637_v12 = vand.u32 4294901760, %v1636_v55  ;;  %v6213_v27 = vand.u32 4294901760, %v5634_v9 }
 0x2d7   :  { %v1651_v62 = vand.u32 4294901760, %v1650_v18  ;;  %v6214_v33 = vand.u32 4294901760, %v5632_v8  ;;  %v6212_v24 = vand.u32 4294901760, %v5636_v41  ;;  %v6211_v18 = vand.u32 4294901760, %v5642_v17 }
 0x2d8   :  { %4434 = vmatpush3.bf16.msra.mxu0 %v5594_v5  ;;  %v1630_v29 = vand.u32 4294901760, %v1629_v50  ;;  %v1685_v55 = vsub.f32 %v5634_v9, %v6213_v27 }
 0x2d9   :  { %4435 = vmatprep.subr.bf16.mxu0 %v4921_v0  ;;  %v5686_v43 = vpack.c.bf16 %v1651_v62, %v1644_v31  ;;  %v1678_v39 = vsub.f32 %v5632_v8, %v6214_v33  ;;  %v6210_v31 = vand.u32 4294901760, %v5644_v49  ;;  %v1699_v44 = vsub.f32 %v5642_v17, %v6211_v18 }
 0x2da   :  { %v5676_v36 = vpack.c.bf16 %v1637_v12, %v1630_v29  ;;  %v1692_v29 = vsub.f32 %v5636_v41, %v6212_v24  ;;  %v1686_v12 = vand.u32 4294901760, %v1685_v55  ;;  %v4481_v55 = vpack.c.bf16 %v5623_v4, %v5621_v61 }
 0x2db   :  { %v1679_v56 = vand.u32 4294901760, %v1678_v39  ;;  %v1706_v10 = vsub.f32 %v5644_v49, %v6210_v31  ;;  %v1700_v11 = vand.u32 4294901760, %v1699_v44  ;;  %v4472_v39 = vpack.c.bf16 %v5608_v54, %v5606_v51  ;;  %v793_v44 = vld [vmem:[%s6188_s4] sm:$0xff] }
 0x2dc   :  { %4437 = vmatpush3.bf16.msra.mxu0 %v5598_v35  ;;  %v1693_v15 = vand.u32 4294901760, %v1692_v29  ;;  %v4484_v29 = vpack.c.bf16 %v5627_v40, %v5625_v30 }
 0x2dd   :  { %4438 = vmatprep.subr.bf16.mxu0 %v4921_v0  ;;  %v5706_v50 = vpack.c.bf16 %v1679_v56, %v1672_v53  ;;  %v1707_v16 = vand.u32 4294901760, %v1706_v10  ;;  %v4475_v53 = vpack.c.bf16 %v5614_v37, %v5612_v3  ;;  %v4478_v56 = vpack.c.bf16 %v5618_v26, %v5616_v57 }
 0x2de   :  { %v4466_v62 = vpack.c.bf16 %v1693_v15, %v1686_v12 }
 0x2df   :  { %v4469_v2 = vpack.c.bf16 %v1707_v16, %v1700_v11  ;;  %v813_v11 = vrot.slane %v793_v44, %v5433_v58 }
 0x2e0   :  { %4440 = vmatpush3.bf16.msra.mxu0 %v5602_v14 }
 0x2e1   :  { %4441 = vmatprep.subr.bf16.mxu0 %v4921_v0 }
 0x2e4   :  { %4443 = vmatpush3.bf16.msra.mxu0 %v5610_v63 }
 0x2e5   :  { %4444 = vmatprep.subr.bf16.mxu0 %v4921_v0 }
 0x2e8   :  { %4446 = vmatpush3.bf16.msra.mxu0 %v5640_v25 }
 0x2e9   :  { %4447 = vmatprep.subr.bf16.mxu0 %v4921_v0 }
 0x3a6   :  { %v1451_v16 = vpop.f32.mrb[0].mxu1 }
 0x3a7   :  { %v4712_v31 = vadd.f32 %v1451_v16, %v813_v11  ;;  %v3714_v18 = vpop.f32.mrb[1].mxu1 }
 0x3a8   :  { %v1477_v18 = vrot.slane %v793_v44, %v5438_v34 }
 0x3a9   :  { %v1455_v24 = vrot.slane %v4712_v31, 4 }
 0x3ab   :  { %v1456_v27 = vadd.f32 %v4712_v31, %v1455_v24 }
 0x3ad   :  { %v1457_v33 = vrot.slane %v1456_v27, 2 }
 0x3af   :  { %v1458_v6 = vadd.f32 %v1457_v33, %v1456_v27  ;;  %v1482_v33 = vrot.slane %v793_v44, %v5440_v60 }
 0x3b1   :  { %v1459_v42 = vrot.slane %v1458_v6, 1 }
 0x3b3   :  { %v1460_v22 = vadd.f32 %v1459_v42, %v1458_v6  ;;  %v6266_v6 = vand.u32 4294901760, %v5614_v37 }
 0x3b5   :  { %v1461_v13 = vmul.f32 0.125, %v1460_v22 }
 0x3b7   :  { %v1462_v48 = vsub.f32 %v4712_v31, %v1461_v13  ;;  %v6269_v31 = vand.u32 4294901760, %v5621_v61  ;;  %v6275_v61 = vand.u32 4294901760, %v5634_v9 }
 0x3b9   :  { %v1463_v21 = vmul.f32 %v1462_v48, %v1462_v48 }
 0x3bb   :  { %v1464_v19 = vrot.slane %v1463_v21, 4 }
 0x3bd   :  { %v1465_v59 = vadd.f32 %v1464_v19, %v1463_v21 }
 0x3bf   :  { %v1466_v52 = vrot.slane %v1465_v59, 2 }
 0x3c1   :  { %v1467_v47 = vadd.f32 %v1466_v52, %v1465_v59 }
 0x3c3   :  { %v1468_v46 = vrot.slane %v1467_v47, 1 }
 0x3c5   :  { %v1469_v10 = vadd.f32 %v1468_v46, %v1467_v47  ;;  %v6260_v46 = vpack.c.bf16 %v5632_v8, %v5630_v7  ;;  %v6261_v47 = vpack.c.bf16 %v5636_v41, %v5634_v9 }
 0x3c7   :  { %v1470_v15 = vmul.f32 0.125, %v1469_v10 }
 0x3c9   :  { %v1471_v12 = vadd.f32 1e-05, %v1470_v15  ;;  %v2185_v15 = vld [vmem:[#allocation10 + $0x38] sm:$0xff] }
 0x3ca   :  { %v2220_v10 = vand.u32 4294901760, %v2185_v15 }
 0x3cb   :  { %4768 = vrsqrt.f32 %v1471_v12  ;;  %v2184_v12 = vld [vmem:[#allocation10 + $0x30] sm:$0xff] }
 0x3cc   :  { %v2217_v44 = vand.u32 4294901760, %v2184_v12 }
 0x3ce   :  { %v5886_v16 = vpack.c.bf16 %v2220_v10, %v2217_v44 }
 0x3d5   :  { %v4769_v11 = vpop.eup %4768 }
 0x3d6   :  { %v1473_v24 = vmul.f32 %v4769_v11, %v1462_v48  ;;  %v6264_v48 = vand.u32 4294901760, %v5608_v54  ;;  %v6268_v54 = vand.u32 4294901760, %v5618_v26  ;;  %v6274_v26 = vand.u32 4294901760, %v5632_v8  ;;  %v2181_v8 = vld [vmem:[#allocation10 + $0x18] sm:$0xff]  ;;  %v2187_v11 = vld [vmem:[#allocation10 + $0x48] sm:$0xff] }
 0x3d7   :  { %v2208_v9 = vand.u32 4294901760, %v2181_v8 }
 0x3d8   :  { %v1478_v27 = vmul.f32 %v1477_v18, %v1473_v24  ;;  %v2186_v18 = vld [vmem:[#allocation10 + $0x40] sm:$0xff] }
 0x3d9   :  { %v2223_v24 = vand.u32 4294901760, %v2186_v18 }
 0x3da   :  { %v1483_v42 = vadd.f32 %v1482_v33, %v1478_v27  ;;  %v2226_v33 = vand.u32 4294901760, %v2187_v11 }
 0x3dc   :  { %v1484_v22 = vmax.f32 %v1483_v42, 0.0  ;;  %v5890_v27 = vpack.c.bf16 %v2226_v33, %v2223_v24  ;;  %v2188_v42 = vld [vmem:[#allocation10 + $0x50] sm:$0xff] }
 0x3de   :  { %v5744_v13 = vand.u32 4294901760, %v1484_v22 }
 0x3e0   :  { %v1588_v19 = vsub.f32 %v1484_v22, %v5744_v13  ;;  %v2189_v22 = vld [vmem:[#allocation10 + $0x58] sm:$0xff] }
 0x3e2   :  { %v1589_v21 = vand.u32 4294901760, %v1588_v19 }
 0x3e4   :  { %v1590_v52 = vsub.f32 %v1588_v19, %v1589_v21 }
 0x3e6   :  { %v1591_v59 = vand.u32 4294901760, %v1590_v52  ;;  %v2190_v52 = vld [vmem:[#allocation10 + $0x60] sm:$0xff] }
 0x3e8   :  { %3748 = vmatmul.mubr.f32.vlgmr.msra.gmra.mrb[2].mxu0 %v1591_v59  ;;  %v2191_v59 = vld [vmem:[#allocation10 + $0x68] sm:$0xff] }
 0x3e9   :  { %4449 = vmatpush3.bf16.msra.mxu0 %v5664_v23  ;;  %3782 = vmatprep.mubr.msk.f32.mxu0 %vm4922_vm0, %v4923_v1  ;;  %v6262_v23 = vpack.c.bf16 %v5644_v49, %v5642_v17 }
 0x3ea   :  { %4450 = vmatprep.subr.bf16.mxu0 %v4921_v0 }
 0x3ed   :  { %4452 = vmatpush3.bf16.msra.mxu0 %v5672_v28  ;;  %v6263_v28 = vand.u32 4294901760, %v5606_v51  ;;  %v6267_v51 = vand.u32 4294901760, %v5616_v57  ;;  %v6273_v57 = vand.u32 4294901760, %v5630_v7 }
 0x3ee   :  { %4453 = vmatprep.subr.bf16.mxu0 %v4921_v0 }
 0x3f1   :  { %4455 = vmatpush3.bf16.msra.mxu0 %v5676_v36  ;;  %v4520_v36 = vpack.c.bf16 %v6264_v48, %v6263_v28 }
 0x3f2   :  { %4456 = vmatprep.subr.bf16.mxu0 %v4921_v0 }
 0x3f5   :  { %4458 = vmatpush3.bf16.msra.mxu0 %v5686_v43  ;;  %v6265_v43 = vand.u32 4294901760, %v5612_v3  ;;  %v6270_v3 = vand.u32 4294901760, %v5623_v4  ;;  %v6276_v4 = vand.u32 4294901760, %v5636_v41  ;;  %v2182_v41 = vld [vmem:[#allocation10 + $0x20] sm:$0xff] }
 0x3f6   :  { %4459 = vmatprep.subr.bf16.mxu0 %v4921_v0 }
 0x3f7   :  { %v4529_v37 = vpack.c.bf16 %v6270_v3, %v6269_v31  ;;  %v5915_v31 = vsub.f32 %v2185_v15, %v2220_v10  ;;  %v5917_v3 = vsub.f32 %v2186_v18, %v2223_v24 }
 0x3f9   :  { %4461 = vmatpush3.bf16.msra.mxu0 %v5696_v38  ;;  %v4523_v38 = vpack.c.bf16 %v6266_v6, %v6265_v43  ;;  %v5906_v43 = vsub.f32 %v2181_v8, %v2208_v9  ;;  %v6234_v24 = vand.u32 4294901760, %v5915_v31 }
 0x3fa   :  { %4462 = vmatprep.subr.bf16.mxu0 %v4921_v0 }
 0x3fd   :  { %4464 = vmatpush3.bf16.msra.mxu0 %v5706_v50  ;;  %v4526_v50 = vpack.c.bf16 %v6268_v54, %v6267_v51  ;;  %v2192_v51 = vld [vmem:[#allocation10 + $0x70] sm:$0xff]  ;;  %v2193_v54 = vld [vmem:[#allocation10 + $0x78] sm:$0xff] }
 0x3fe   :  { %4465 = vmatprep.subr.bf16.mxu0 %v4921_v0 }
 0x401   :  { %4467 = vmatpush3.bf16.msra.mxu0 %v4466_v62  ;;  %v6271_v62 = vand.u32 4294901760, %v5625_v30  ;;  %v6277_v30 = vand.u32 4294901760, %v5642_v17  ;;  %v2211_v17 = vand.u32 4294901760, %v2182_v41 }
 0x402   :  { %4468 = vmatprep.subr.bf16.mxu0 %v4921_v0 }
 0x403   :  { %v5908_v6 = vsub.f32 %v2182_v41, %v2211_v17 }
 0x405   :  { %4470 = vmatpush3.bf16.msra.mxu0 %v4469_v2  ;;  %v6272_v2 = vand.u32 4294901760, %v5627_v40  ;;  %v6278_v40 = vand.u32 4294901760, %v5644_v49 }
 0x406   :  { %4471 = vmatprep.subr.bf16.mxu0 %v4921_v0 }
 0x408   :  { %3783 = vmatmul.mubr.f32.vlgmr.msra.gmra.mrb[2].mxu0 %v5744_v13 }
 0x409   :  { %4473 = vmatpush3.bf16.msra.mxu0 %v4472_v39  ;;  %3817 = vmatprep.mubr.msk.f32.mxu0 %vm4922_vm0, %v4923_v1  ;;  %v4532_v39 = vpack.c.bf16 %v6272_v2, %v6271_v62 }
 0x40a   :  { %4474 = vmatprep.subr.bf16.mxu0 %v4921_v0 }
 0x40d   :  { %4476 = vmatpush3.bf16.msra.mxu0 %v4475_v53  ;;  %v4535_v53 = vpack.c.bf16 %v6274_v26, %v6273_v57  ;;  %v2241_v26 = vand.u32 4294901760, %v2192_v51 }
 0x40e   :  { %4477 = vmatprep.subr.bf16.mxu0 %v4921_v0 }
 0x411   :  { %4479 = vmatpush3.bf16.msra.mxu0 %v4478_v56  ;;  %v4538_v56 = vpack.c.bf16 %v6276_v4, %v6275_v61 }
 0x412   :  { %4480 = vmatprep.subr.bf16.mxu0 %v4921_v0 }
 0x415   :  { %4482 = vmatpush3.bf16.msra.mxu0 %v4481_v55  ;;  %v4541_v55 = vpack.c.bf16 %v6278_v40, %v6277_v30  ;;  %v5934_v30 = vsub.f32 %v2192_v51, %v2241_v26 }
 0x416   :  { %4483 = vmatprep.subr.bf16.mxu0 %v4921_v0 }
 0x419   :  { %4485 = vmatpush3.bf16.msra.mxu0 %v4484_v29 }
 0x41a   :  { %4486 = vmatprep.subr.bf16.mxu0 %v4921_v0 }
 0x41d   :  { %4488 = vmatpush3.bf16.msra.mxu0 %v6260_v46  ;;  %v2235_v46 = vand.u32 4294901760, %v2190_v52 }
 0x41e   :  { %4489 = vmatprep.subr.bf16.mxu0 %v4921_v0 }
 0x421   :  { %4491 = vmatpush3.bf16.msra.mxu0 %v6261_v47  ;;  %v2238_v47 = vand.u32 4294901760, %v2191_v59 }
 0x422   :  { %4492 = vmatprep.subr.bf16.mxu0 %v4921_v0 }
 0x423   :  { %v5902_v48 = vpack.c.bf16 %v2238_v47, %v2235_v46  ;;  %v5928_v57 = vsub.f32 %v2191_v59, %v2238_v47 }
 0x425   :  { %4494 = vmatpush3.bf16.msra.mxu0 %v6262_v23 }
 0x426   :  { %4495 = vmatprep.subr.bf16.mxu0 %v4921_v0 }
 0x428   :  { %3818 = vmatmul.mubr.f32.vlgmr.msra.gmra.mrb[2].mxu0 %v1588_v19  ;;  %v2232_v19 = vand.u32 4294901760, %v2189_v22 }
 0x429   :  { %4497 = vmatpush3.bf16.msra.mxu0 %v5582_v32  ;;  %3852 = vmatprep.mubr.msk.f32.mxu0 %vm4922_vm0, %v4923_v1 }
 0x42a   :  { %4498 = vmatprep.subr.bf16.mxu0 %v4921_v0  ;;  %v5924_v2 = vsub.f32 %v2189_v22, %v2232_v19  ;;  %v2342_v22 = vsub.f32 %v5915_v31, %v6234_v24 }
 0x42d   :  { %4500 = vmatpush3.bf16.msra.mxu0 %v5586_v20 }
 0x42e   :  { %4501 = vmatprep.subr.bf16.mxu0 %v4921_v0 }
 0x431   :  { %4503 = vmatpush3.bf16.msra.mxu0 %v5590_v45 }
 0x432   :  { %4504 = vmatprep.subr.bf16.mxu0 %v4921_v0 }
 0x435   :  { %4506 = vmatpush3.bf16.msra.mxu0 %v5594_v5 }
 0x436   :  { %4507 = vmatprep.subr.bf16.mxu0 %v4921_v0 }
 0x439   :  { %4509 = vmatpush3.bf16.msra.mxu0 %v5598_v35 }
 0x43a   :  { %4510 = vmatprep.subr.bf16.mxu0 %v4921_v0 }
 0x43d   :  { %4512 = vmatpush3.bf16.msra.mxu0 %v5602_v14 }
 0x43e   :  { %4513 = vmatprep.subr.bf16.mxu0 %v4921_v0 }
 0x441   :  { %4515 = vmatpush3.bf16.msra.mxu0 %v5610_v63 }
 0x442   :  { %4516 = vmatprep.subr.bf16.mxu0 %v4921_v0 }
 0x445   :  { %4518 = vmatpush3.bf16.msra.mxu0 %v5640_v25 }
 0x446   :  { %4519 = vmatprep.subr.bf16.mxu0 %v4921_v0 }
 0x448   :  { %3853 = vmatmul.mubr.f32.vlgmr.msra.gmra.mrb[2].mxu0 %v1589_v21 }
 0x449   :  { %4521 = vmatpush3.bf16.msra.mxu0 %v4520_v36  ;;  %3887 = vmatprep.mubr.msk.f32.mxu0 %vm4922_vm0, %v4923_v1 }
 0x44a   :  { %4522 = vmatprep.subr.bf16.mxu0 %v4921_v0 }
 0x44d   :  { %4524 = vmatpush3.bf16.msra.mxu0 %v4523_v38 }
 0x44e   :  { %4525 = vmatprep.subr.bf16.mxu0 %v4921_v0 }
 0x451   :  { %4527 = vmatpush3.bf16.msra.mxu0 %v4526_v50  ;;  %v5913_v50 = vsub.f32 %v2184_v12, %v2217_v44 }
 0x452   :  { %4528 = vmatprep.subr.bf16.mxu0 %v4921_v0 }
 0x455   :  { %4530 = vmatpush3.bf16.msra.mxu0 %v4529_v37  ;;  %v5919_v37 = vsub.f32 %v2187_v11, %v2226_v33  ;;  %v6235_v11 = vand.u32 4294901760, %v5913_v50 }
 0x456   :  { %4531 = vmatprep.subr.bf16.mxu0 %v4921_v0 }
 0x457   :  { %v6232_v59 = vand.u32 4294901760, %v5919_v37 }
 0x459   :  { %4533 = vmatpush3.bf16.msra.mxu0 %v4532_v39  ;;  %v5926_v39 = vsub.f32 %v2190_v52, %v2235_v46  ;;  %v6233_v52 = vand.u32 4294901760, %v5917_v3  ;;  %v2356_v51 = vsub.f32 %v5919_v37, %v6232_v59 }
 0x45a   :  { %4534 = vmatprep.subr.bf16.mxu0 %v4921_v0 }
 0x45b   :  { %v2349_v47 = vsub.f32 %v5917_v3, %v6233_v52 }
 0x45d   :  { %4536 = vmatpush3.bf16.msra.mxu0 %v4535_v53  ;;  %v2244_v53 = vand.u32 4294901760, %v2193_v54 }
 0x45e   :  { %4537 = vmatprep.subr.bf16.mxu0 %v4921_v0 }
 0x45f   :  { %v5936_v40 = vsub.f32 %v2193_v54, %v2244_v53  ;;  %v2350_v54 = vand.u32 4294901760, %v2349_v47 }
 0x461   :  { %4539 = vmatpush3.bf16.msra.mxu0 %v4538_v56  ;;  %v5932_v56 = vpack.c.bf16 %v2244_v53, %v2241_v26  ;;  %v2357_v26 = vand.u32 4294901760, %v2356_v51 }
 0x462   :  { %4540 = vmatprep.subr.bf16.mxu0 %v4921_v0 }
 0x465   :  { %4542 = vmatpush3.bf16.msra.mxu0 %v4541_v55 }
 0x466   :  { %4543 = vmatprep.subr.bf16.mxu0 %v4921_v0 }
 0x468   :  { %3888 = vmatmul.mubr.f32.vlgmr.msra.gmra.mrb[2].mxu0 %v5744_v13 }
 0x469   :  { %4545 = vmatpush3.bf16.msra.mxu0 %v5582_v32  ;;  %3922 = vmatprep.mubr.msk.f32.mxu0 %vm4922_vm0, %v4923_v1  ;;  %v2178_v32 = vld [vmem:[#allocation10] sm:$0xff] }
 0x46a   :  { %4546 = vmatprep.subr.bf16.mxu0 %v4921_v0 }
 0x46d   :  { %4548 = vmatpush3.bf16.msra.mxu0 %v5586_v20  ;;  %v2179_v20 = vld [vmem:[#allocation10 + $0x8] sm:$0xff] }
 0x46e   :  { %4549 = vmatprep.subr.bf16.mxu0 %v4921_v0 }
 0x471   :  { %4551 = vmatpush3.bf16.msra.mxu0 %v5590_v45  ;;  %v2199_v45 = vand.u32 4294901760, %v2178_v32 }
 0x472   :  { %4552 = vmatprep.subr.bf16.mxu0 %v4921_v0 }
 0x473   :  { %v5898_v23 = vsub.f32 %v2178_v32, %v2199_v45 }
 0x475   :  { %4554 = vmatpush3.bf16.msra.mxu0 %v5594_v5  ;;  %v2202_v5 = vand.u32 4294901760, %v2179_v20  ;;  %v6241_v61 = vand.u32 4294901760, %v5898_v23 }
 0x476   :  { %4555 = vmatprep.subr.bf16.mxu0 %v4921_v0 }
 0x477   :  { %v5874_v7 = vpack.c.bf16 %v2202_v5, %v2199_v45  ;;  %v5900_v28 = vsub.f32 %v2179_v20, %v2202_v5  ;;  %v2293_v55 = vsub.f32 %v5898_v23, %v6241_v61  ;;  %v6238_v45 = vand.u32 4294901760, %v5906_v43 }
 0x479   :  { %4557 = vmatpush3.bf16.msra.mxu0 %v5598_v35  ;;  %v2180_v35 = vld [vmem:[#allocation10 + $0x10] sm:$0xff]  ;;  %4569 = vmatpush3.bf16.msra.mxu1 %v5874_v7  ;;  %v6240_v4 = vand.u32 4294901760, %v5900_v28  ;;  %v2294_v5 = vand.u32 4294901760, %v2293_v55  ;;  %v6230_v55 = vand.u32 4294901760, %v5924_v2 }
 0x47a   :  { %4558 = vmatprep.subr.bf16.mxu0 %v4921_v0  ;;  %4570 = vmatprep.subr.bf16.mxu1 %v4921_v0 }
 0x47b   :  { %v2300_v32 = vsub.f32 %v5900_v28, %v6240_v4 }
 0x47d   :  { %4560 = vmatpush3.bf16.msra.mxu0 %v5602_v14  ;;  %v2205_v14 = vand.u32 4294901760, %v2180_v35 }
 0x47e   :  { %4561 = vmatprep.subr.bf16.mxu0 %v4921_v0 }
 0x47f   :  { %v5904_v36 = vsub.f32 %v2180_v35, %v2205_v14  ;;  %v2301_v35 = vand.u32 4294901760, %v2300_v32  ;;  %v5988_v32 = vpack.c.bf16 %v2357_v26, %v2350_v54 }
 0x481   :  { %4563 = vmatpush3.bf16.msra.mxu0 %v5610_v63  ;;  %v5878_v63 = vpack.c.bf16 %v2208_v9, %v2205_v14  ;;  %v6239_v20 = vand.u32 4294901760, %v5904_v36  ;;  %v2314_v14 = vsub.f32 %v5906_v43, %v6238_v45  ;;  %v6237_v9 = vand.u32 4294901760, %v5908_v6 }
 0x482   :  { %4564 = vmatprep.subr.bf16.mxu0 %v4921_v0 }
 0x483   :  { %4572 = vmatpush3.bf16.msra.mxu1 %v5878_v63  ;;  %v2307_v8 = vsub.f32 %v5904_v36, %v6239_v20  ;;  %v2321_v12 = vsub.f32 %v5908_v6, %v6237_v9 }
 0x484   :  { %4573 = vmatprep.subr.bf16.mxu1 %v4921_v0 }
 0x485   :  { %4566 = vmatpush3.bf16.msra.mxu0 %v5640_v25  ;;  %v2183_v25 = vld [vmem:[#allocation10 + $0x28] sm:$0xff]  ;;  %v2322_v10 = vand.u32 4294901760, %v2321_v12 }
 0x486   :  { %v2214_v49 = vand.u32 4294901760, %v2183_v25 }
 0x488   :  { %3923 = vmatmul.mubr.f32.vlgmr.msra.gmra.mrb[2].mxu0 %v5744_v13  ;;  %v5882_v29 = vpack.c.bf16 %v2214_v49, %v2211_v17  ;;  %v2229_v13 = vand.u32 4294901760, %v2188_v42  ;;  %v5910_v38 = vsub.f32 %v2183_v25, %v2214_v49  ;;  %v5956_v25 = vpack.c.bf16 %v2301_v35, %v2294_v5 }
 0x489   :  { %v2308_v17 = vand.u32 4294901760, %v2307_v8  ;;  %v2315_v49 = vand.u32 4294901760, %v2314_v14  ;;  %v2370_v35 = vsub.f32 %v5924_v2, %v6230_v55 }
 0x48a   :  { %4575 = vmatpush3.bf16.msra.mxu1 %v5882_v29  ;;  %v5894_v21 = vpack.c.bf16 %v2232_v19, %v2229_v13  ;;  %v5922_v62 = vsub.f32 %v2188_v42, %v2229_v13  ;;  %v6236_v41 = vand.u32 4294901760, %v5910_v38  ;;  %v2335_v42 = vsub.f32 %v5913_v50, %v6235_v11 }
 0x48b   :  { %4576 = vmatprep.subr.bf16.mxu1 %v4921_v0  ;;  %v5964_v44 = vpack.c.bf16 %v2315_v49, %v2308_v17  ;;  %v2343_v19 = vand.u32 4294901760, %v2342_v22  ;;  %v2371_v14 = vand.u32 4294901760, %v2370_v35  ;;  %v6229_v17 = vand.u32 4294901760, %v5926_v39 }
 0x48c   :  { %v2328_v15 = vsub.f32 %v5910_v38, %v6236_v41  ;;  %v2336_v13 = vand.u32 4294901760, %v2335_v42  ;;  %v6231_v53 = vand.u32 4294901760, %v5922_v62  ;;  %v6228_v49 = vand.u32 4294901760, %v5928_v57 }
 0x48d   :  { %v6227_v22 = vand.u32 4294901760, %v5934_v30  ;;  %v4616_v35 = vpack.c.bf16 %v5900_v28, %v5898_v23 }
 0x48e   :  { %4578 = vmatpush3.bf16.msra.mxu1 %v5886_v16  ;;  %v2329_v18 = vand.u32 4294901760, %v2328_v15  ;;  %v5978_v46 = vpack.c.bf16 %v2343_v19, %v2336_v13  ;;  %v2363_v5 = vsub.f32 %v5922_v62, %v6231_v53  ;;  %v2377_v15 = vsub.f32 %v5926_v39, %v6229_v17 }
 0x48f   :  { %4579 = vmatprep.subr.bf16.mxu1 %v4921_v0  ;;  %v6226_v13 = vand.u32 4294901760, %v5936_v40  ;;  %v2391_v47 = vsub.f32 %v5934_v30, %v6227_v22 }
 0x490   :  { %v5968_v33 = vpack.c.bf16 %v2329_v18, %v2322_v10  ;;  %v2364_v8 = vand.u32 4294901760, %v2363_v5  ;;  %v2384_v10 = vsub.f32 %v5928_v57, %v6228_v49  ;;  %v2378_v18 = vand.u32 4294901760, %v2377_v15 }
 0x491   :  { %v2398_v51 = vsub.f32 %v5936_v40, %v6226_v13  ;;  %v2392_v54 = vand.u32 4294901760, %v2391_v47  ;;  %v4625_v15 = vpack.c.bf16 %v5915_v31, %v5913_v50  ;;  %v1485_v47 = vld [vmem:[%s6190_s6] sm:$0xff] }
 0x492   :  { %4581 = vmatpush3.bf16.msra.mxu1 %v5890_v27  ;;  %v5998_v12 = vpack.c.bf16 %v2371_v14, %v2364_v8  ;;  %v2385_v42 = vand.u32 4294901760, %v2384_v10  ;;  %v4619_v8 = vpack.c.bf16 %v5906_v43, %v5904_v36  ;;  %v4622_v14 = vpack.c.bf16 %v5910_v38, %v5908_v6 }
 0x493   :  { %4582 = vmatprep.subr.bf16.mxu1 %v4921_v0  ;;  %v2399_v26 = vand.u32 4294901760, %v2398_v51  ;;  %v4628_v10 = vpack.c.bf16 %v5919_v37, %v5917_v3 }
 0x494   :  { %v4610_v19 = vpack.c.bf16 %v2385_v42, %v2378_v18 }
 0x495   :  { %v4613_v5 = vpack.c.bf16 %v2399_v26, %v2392_v54  ;;  %v1505_v54 = vrot.slane %v1485_v47, %v5433_v58 }
 0x496   :  { %4584 = vmatpush3.bf16.msra.mxu1 %v5894_v21 }
 0x497   :  { %4585 = vmatprep.subr.bf16.mxu1 %v4921_v0 }
 0x49a   :  { %4587 = vmatpush3.bf16.msra.mxu1 %v5902_v48 }
 0x49b   :  { %4588 = vmatprep.subr.bf16.mxu1 %v4921_v0 }
 0x49e   :  { %4590 = vmatpush3.bf16.msra.mxu1 %v5932_v56 }
 0x49f   :  { %4591 = vmatprep.subr.bf16.mxu1 %v4921_v0 }
 0x55b   :  { %v2143_v26 = vpop.f32.mrb[2].mxu0 }
 0x55c   :  { %v4713_v13 = vadd.f32 %v2143_v26, %v1505_v54  ;;  %v3924_v22 = vpop.f32.mrb[3].mxu0 }
 0x55d   :  { %v2169_v22 = vrot.slane %v1485_v47, %v5438_v34 }
 0x55e   :  { %v2147_v49 = vrot.slane %v4713_v13, 4 }
 0x560   :  { %v2148_v17 = vadd.f32 %v4713_v13, %v2147_v49 }
 0x562   :  { %v2149_v55 = vrot.slane %v2148_v17, 2 }
 0x564   :  { %v2150_v53 = vadd.f32 %v2149_v55, %v2148_v17  ;;  %v2174_v55 = vrot.slane %v1485_v47, %v5440_v60 }
 0x566   :  { %v2151_v59 = vrot.slane %v2150_v53, 1 }
 0x568   :  { %v2152_v52 = vadd.f32 %v2151_v59, %v2150_v53  ;;  %v6285_v53 = vand.u32 4294901760, %v5906_v43 }
 0x56a   :  { %v2153_v24 = vmul.f32 0.125, %v2152_v52 }
 0x56c   :  { %v2154_v11 = vsub.f32 %v4713_v13, %v2153_v24  ;;  %v6288_v13 = vand.u32 4294901760, %v5913_v50  ;;  %v6294_v50 = vand.u32 4294901760, %v5926_v39 }
 0x56e   :  { %v2155_v41 = vmul.f32 %v2154_v11, %v2154_v11 }
 0x570   :  { %v2156_v9 = vrot.slane %v2155_v41, 4 }
 0x572   :  { %v2157_v45 = vadd.f32 %v2156_v9, %v2155_v41 }
 0x574   :  { %v2158_v20 = vrot.slane %v2157_v45, 2 }
 0x576   :  { %v2159_v4 = vadd.f32 %v2158_v20, %v2157_v45 }
 0x578   :  { %v2160_v61 = vrot.slane %v2159_v4, 1 }
 0x57a   :  { %v2161_v51 = vadd.f32 %v2160_v61, %v2159_v4  ;;  %v6279_v61 = vpack.c.bf16 %v5924_v2, %v5922_v62  ;;  %v6280_v4 = vpack.c.bf16 %v5928_v57, %v5926_v39 }
 0x57c   :  { %v2162_v42 = vmul.f32 0.125, %v2161_v51 }
 0x57e   :  { %v2163_v18 = vadd.f32 1e-05, %v2162_v42 }
 0x580   :  { %4770 = vrsqrt.f32 %v2163_v18 }
 0x58a   :  { %v4771_v54 = vpop.eup %4770 }
 0x58b   :  { %v2165_v49 = vmul.f32 %v4771_v54, %v2154_v11  ;;  %v6283_v11 = vand.u32 4294901760, %v5900_v28  ;;  %v6287_v28 = vand.u32 4294901760, %v5910_v38  ;;  %v6293_v38 = vand.u32 4294901760, %v5924_v2 }
 0x58d   :  { %v2170_v17 = vmul.f32 %v2169_v22, %v2165_v49 }
 0x58f   :  { %v2175_v59 = vadd.f32 %v2174_v55, %v2170_v17 }
 0x591   :  { %v2176_v52 = vmax.f32 %v2175_v59, 0.0 }
 0x593   :  { %v6036_v24 = vand.u32 4294901760, %v2176_v52 }
 0x595   :  { %v2280_v9 = vsub.f32 %v2176_v52, %v6036_v24 }
 0x597   :  { %v2281_v41 = vand.u32 4294901760, %v2280_v9 }
 0x599   :  { %v2282_v20 = vsub.f32 %v2280_v9, %v2281_v41 }
 0x59b   :  { %v2283_v45 = vand.u32 4294901760, %v2282_v20 }
 0x59d   :  { %3958 = vmatmul.mubr.f32.vlgmr.msra.gmra.mrb[2].mxu1 %v2283_v45 }
 0x59e   :  { %4593 = vmatpush3.bf16.msra.mxu1 %v5956_v25  ;;  %3992 = vmatprep.mubr.msk.f32.mxu1 %vm4922_vm0, %v4923_v1  ;;  %v6281_v25 = vpack.c.bf16 %v5936_v40, %v5934_v30 }
 0x59f   :  { %4594 = vmatprep.subr.bf16.mxu1 %v4921_v0 }
 0x5a2   :  { %4596 = vmatpush3.bf16.msra.mxu1 %v5964_v44  ;;  %v6282_v44 = vand.u32 4294901760, %v5898_v23  ;;  %v6286_v23 = vand.u32 4294901760, %v5908_v6  ;;  %v6292_v6 = vand.u32 4294901760, %v5922_v62 }
 0x5a3   :  { %4597 = vmatprep.subr.bf16.mxu1 %v4921_v0 }
 0x5a6   :  { %4599 = vmatpush3.bf16.msra.mxu1 %v5968_v33  ;;  %v4664_v33 = vpack.c.bf16 %v6283_v11, %v6282_v44 }
 0x5a7   :  { %4600 = vmatprep.subr.bf16.mxu1 %v4921_v0 }
 0x5aa   :  { %4602 = vmatpush3.bf16.msra.mxu1 %v5978_v46  ;;  %v6284_v46 = vand.u32 4294901760, %v5904_v36  ;;  %v6289_v36 = vand.u32 4294901760, %v5915_v31  ;;  %v6295_v31 = vand.u32 4294901760, %v5928_v57 }
 0x5ab   :  { %4603 = vmatprep.subr.bf16.mxu1 %v4921_v0 }
 0x5ac   :  { %v4673_v43 = vpack.c.bf16 %v6289_v36, %v6288_v13 }
 0x5ae   :  { %4605 = vmatpush3.bf16.msra.mxu1 %v5988_v32  ;;  %v4667_v32 = vpack.c.bf16 %v6285_v53, %v6284_v46 }
 0x5af   :  { %4606 = vmatprep.subr.bf16.mxu1 %v4921_v0 }
 0x5b2   :  { %4608 = vmatpush3.bf16.msra.mxu1 %v5998_v12  ;;  %v4670_v12 = vpack.c.bf16 %v6287_v28, %v6286_v23 }
 0x5b3   :  { %4609 = vmatprep.subr.bf16.mxu1 %v4921_v0 }
 0x5b6   :  { %4611 = vmatpush3.bf16.msra.mxu1 %v4610_v19  ;;  %v6290_v19 = vand.u32 4294901760, %v5917_v3  ;;  %v6296_v3 = vand.u32 4294901760, %v5934_v30 }
 0x5b7   :  { %4612 = vmatprep.subr.bf16.mxu1 %v4921_v0 }
 0x5ba   :  { %4614 = vmatpush3.bf16.msra.mxu1 %v4613_v5  ;;  %v6291_v5 = vand.u32 4294901760, %v5919_v37  ;;  %v6297_v37 = vand.u32 4294901760, %v5936_v40 }
 0x5bb   :  { %4615 = vmatprep.subr.bf16.mxu1 %v4921_v0 }
 0x5bd   :  { %3993 = vmatmul.mubr.f32.vlgmr.msra.gmra.mrb[2].mxu1 %v6036_v24 }
 0x5be   :  { %4617 = vmatpush3.bf16.msra.mxu1 %v4616_v35  ;;  %4027 = vmatprep.mubr.msk.f32.mxu1 %vm4922_vm0, %v4923_v1  ;;  %v4676_v35 = vpack.c.bf16 %v6291_v5, %v6290_v19 }
 0x5bf   :  { %4618 = vmatprep.subr.bf16.mxu1 %v4921_v0 }
 0x5c2   :  { %4620 = vmatpush3.bf16.msra.mxu1 %v4619_v8  ;;  %v4679_v8 = vpack.c.bf16 %v6293_v38, %v6292_v6 }
 0x5c3   :  { %4621 = vmatprep.subr.bf16.mxu1 %v4921_v0 }
 0x5c6   :  { %4623 = vmatpush3.bf16.msra.mxu1 %v4622_v14  ;;  %v4682_v14 = vpack.c.bf16 %v6295_v31, %v6294_v50 }
 0x5c7   :  { %4624 = vmatprep.subr.bf16.mxu1 %v4921_v0 }
 0x5ca   :  { %4626 = vmatpush3.bf16.msra.mxu1 %v4625_v15  ;;  %v4685_v15 = vpack.c.bf16 %v6297_v37, %v6296_v3 }
 0x5cb   :  { %4627 = vmatprep.subr.bf16.mxu1 %v4921_v0 }
 0x5ce   :  { %4629 = vmatpush3.bf16.msra.mxu1 %v4628_v10 }
 0x5cf   :  { %4630 = vmatprep.subr.bf16.mxu1 %v4921_v0 }
 0x5d2   :  { %4632 = vmatpush3.bf16.msra.mxu1 %v6279_v61 }
 0x5d3   :  { %4633 = vmatprep.subr.bf16.mxu1 %v4921_v0 }
 0x5d6   :  { %4635 = vmatpush3.bf16.msra.mxu1 %v6280_v4 }
 0x5d7   :  { %4636 = vmatprep.subr.bf16.mxu1 %v4921_v0 }
 0x5da   :  { %4638 = vmatpush3.bf16.msra.mxu1 %v6281_v25 }
 0x5db   :  { %4639 = vmatprep.subr.bf16.mxu1 %v4921_v0 }
 0x5dd   :  { %4028 = vmatmul.mubr.f32.vlgmr.msra.gmra.mrb[2].mxu1 %v2280_v9 }
 0x5de   :  { %4641 = vmatpush3.bf16.msra.mxu1 %v5874_v7  ;;  %4062 = vmatprep.mubr.msk.f32.mxu1 %vm4922_vm0, %v4923_v1 }
 0x5df   :  { %4642 = vmatprep.subr.bf16.mxu1 %v4921_v0 }
 0x5e2   :  { %4644 = vmatpush3.bf16.msra.mxu1 %v5878_v63 }
 0x5e3   :  { %4645 = vmatprep.subr.bf16.mxu1 %v4921_v0 }
 0x5e6   :  { %4647 = vmatpush3.bf16.msra.mxu1 %v5882_v29 }
 0x5e7   :  { %4648 = vmatprep.subr.bf16.mxu1 %v4921_v0 }
 0x5ea   :  { %4650 = vmatpush3.bf16.msra.mxu1 %v5886_v16 }
 0x5eb   :  { %4651 = vmatprep.subr.bf16.mxu1 %v4921_v0 }
 0x5ee   :  { %4653 = vmatpush3.bf16.msra.mxu1 %v5890_v27 }
 0x5ef   :  { %4654 = vmatprep.subr.bf16.mxu1 %v4921_v0 }
 0x5f2   :  { %4656 = vmatpush3.bf16.msra.mxu1 %v5894_v21 }
 0x5f3   :  { %4657 = vmatprep.subr.bf16.mxu1 %v4921_v0 }
 0x5f6   :  { %4659 = vmatpush3.bf16.msra.mxu1 %v5902_v48 }
 0x5f7   :  { %4660 = vmatprep.subr.bf16.mxu1 %v4921_v0 }
 0x5fa   :  { %4662 = vmatpush3.bf16.msra.mxu1 %v5932_v56 }
 0x5fb   :  { %4663 = vmatprep.subr.bf16.mxu1 %v4921_v0 }
 0x5fd   :  { %4063 = vmatmul.mubr.f32.vlgmr.msra.gmra.mrb[2].mxu1 %v2281_v41 }
 0x5fe   :  { %4665 = vmatpush3.bf16.msra.mxu1 %v4664_v33  ;;  %4097 = vmatprep.mubr.msk.f32.mxu1 %vm4922_vm0, %v4923_v1 }
 0x5ff   :  { %4666 = vmatprep.subr.bf16.mxu1 %v4921_v0 }
 0x602   :  { %4668 = vmatpush3.bf16.msra.mxu1 %v4667_v32 }
 0x603   :  { %4669 = vmatprep.subr.bf16.mxu1 %v4921_v0 }
 0x606   :  { %4671 = vmatpush3.bf16.msra.mxu1 %v4670_v12 }
 0x607   :  { %4672 = vmatprep.subr.bf16.mxu1 %v4921_v0 }
 0x60a   :  { %4674 = vmatpush3.bf16.msra.mxu1 %v4673_v43 }
 0x60b   :  { %4675 = vmatprep.subr.bf16.mxu1 %v4921_v0 }
 0x60e   :  { %4677 = vmatpush3.bf16.msra.mxu1 %v4676_v35 }
 0x60f   :  { %4678 = vmatprep.subr.bf16.mxu1 %v4921_v0 }
 0x612   :  { %4680 = vmatpush3.bf16.msra.mxu1 %v4679_v8 }
 0x613   :  { %4681 = vmatprep.subr.bf16.mxu1 %v4921_v0 }
 0x616   :  { %4683 = vmatpush3.bf16.msra.mxu1 %v4682_v14 }
 0x617   :  { %4684 = vmatprep.subr.bf16.mxu1 %v4921_v0 }
 0x61a   :  { %4686 = vmatpush3.bf16.msra.mxu1 %v4685_v15 }
 0x61b   :  { %4687 = vmatprep.subr.bf16.mxu1 %v4921_v0 }
 0x61d   :  { %4098 = vmatmul.mubr.f32.vlgmr.msra.gmra.mrb[2].mxu1 %v6036_v24 }
 0x61e   :  { %4689 = vmatpush3.bf16.msra.mxu1 %v5874_v7  ;;  %4132 = vmatprep.mubr.msk.f32.mxu1 %vm4922_vm0, %v4923_v1  ;;  %v2177_v1 = vld [vmem:[%s6192_s8] sm:$0xff]  ;;  %s4924_s8 = smov [#allocation11]  }
 0x61f   :  { %4690 = vmatprep.subr.bf16.mxu1 %v4921_v0  ;;  %v2197_v7 = vrot.slane %v2177_v1, %v5433_v58  ;;  %v2861_v26 = vrot.slane %v2177_v1, %v5438_v34  ;;  %v2866_v49 = vrot.slane %v2177_v1, %v5440_v60  ;;  %s2876_s28 = sshll.u32 %s4924_s8, 4  ;;  %s2877_s28 = int_to_ptr.vmem [resolvable:$true] %s2876_s28 }
 0x620   :  { %s4884_s29 = scalar_lea.vmem %s2877_s28, 128  ;;  %p4889_p13 = scmp.lt.s32.totalorder %s2877_s28, %s2877_s28 }
 0x621   :  { %p4885_p12 = scmp.ne.s32.totalorder %s2877_s28, %s4884_s29  ;;  %p4890_p0 = scmp.lt.s32.totalorder %s4884_s29, %s4884_s29 }
 0x622   :  { %4692 = vmatpush3.bf16.msra.mxu1 %v5878_v63 }
 0x623   :  { %4693 = vmatprep.subr.bf16.mxu1 %v4921_v0  ;;  %p4891_p1 = por %p4890_p0, %p4889_p13 }
 0x625   :  { %p4892_p2 = pnand %p4891_p1, %p4885_p12 }
 0x626   :  { %4695 = vmatpush3.bf16.msra.mxu1 %v5882_v29 }
 0x627   :  { %4696 = vmatprep.subr.bf16.mxu1 %v4921_v0 }
 0x62a   :  { %4698 = vmatpush3.bf16.msra.mxu1 %v5886_v16 }
 0x62b   :  { %4699 = vmatprep.subr.bf16.mxu1 %v4921_v0 }
 0x62e   :  { %4701 = vmatpush3.bf16.msra.mxu1 %v5890_v27 }
 0x62f   :  { %4702 = vmatprep.subr.bf16.mxu1 %v4921_v0 }
 0x632   :  { %4704 = vmatpush3.bf16.msra.mxu1 %v5894_v21 }
 0x633   :  { %4705 = vmatprep.subr.bf16.mxu1 %v4921_v0 }
 0x636   :  { %4707 = vmatpush3.bf16.msra.mxu1 %v5902_v48 }
 0x637   :  { %4708 = vmatprep.subr.bf16.mxu1 %v4921_v0 }
 0x63a   :  { %4710 = vmatpush3.bf16.msra.mxu1 %v5932_v56 }
 0x63d   :  { %4133 = vmatmul.mubr.f32.vlgmr.msra.gmra.mrb[2].mxu1 %v6036_v24 }
 0x710   :  { %v2835_v63 = vpop.f32.mrb[2].mxu1 }
 0x711   :  { %v4714_v29 = vadd.f32 %v2835_v63, %v2197_v7  ;;  %v4134_v16 = vpop.f32.mrb[3].mxu1 }
 0x713   :  { %v2839_v27 = vrot.slane %v4714_v29, 4 }
 0x715   :  { %v2840_v21 = vadd.f32 %v4714_v29, %v2839_v27 }
 0x717   :  { %v2841_v62 = vrot.slane %v2840_v21, 2 }
 0x719   :  { %v2842_v2 = vadd.f32 %v2841_v62, %v2840_v21 }
 0x71b   :  { %v2843_v48 = vrot.slane %v2842_v2, 1 }
 0x71d   :  { %v2844_v39 = vadd.f32 %v2843_v48, %v2842_v2 }
 0x71f   :  { %v2845_v0 = vmul.f32 0.125, %v2844_v39 }
 0x721   :  { %v2846_v57 = vsub.f32 %v4714_v29, %v2845_v0 }
 0x723   :  { %v2847_v56 = vmul.f32 %v2846_v57, %v2846_v57 }
 0x725   :  { %v2848_v30 = vrot.slane %v2847_v56, 4 }
 0x727   :  { %v2849_v40 = vadd.f32 %v2848_v30, %v2847_v56 }
 0x729   :  { %v2850_v10 = vrot.slane %v2849_v40, 2 }
 0x72b   :  { %v2851_v18 = vadd.f32 %v2850_v10, %v2849_v40 }
 0x72d   :  { %v2852_v42 = vrot.slane %v2851_v18, 1 }
 0x72f   :  { %v2853_v47 = vadd.f32 %v2852_v42, %v2851_v18 }
 0x731   :  { %v2854_v51 = vmul.f32 0.125, %v2853_v47 }
 0x733   :  { %v2855_v58 = vadd.f32 1e-05, %v2854_v51 }
 0x735   :  { %4772 = vrsqrt.f32 %v2855_v58 }
 0x73f   :  { %v4773_v22 = vpop.eup %4772 }
 0x740   :  { %v2857_v54 = vmul.f32 %v4773_v22, %v2846_v57 }
 0x742   :  { %v2862_v55 = vmul.f32 %v2861_v26, %v2857_v54 }
 0x744   :  { %v2867_v17 = vadd.f32 %v2866_v49, %v2862_v55 }
 0x746   :  { %v2868_v59 = vmax.f32 %v2867_v17, 0.0 }
 0x748   :  { %2869 = vst [vmem:[#allocation11] sm:$0xff] %v2868_v59 }
 0x749   :  { %4895 = shalt.err (!%p4892_p2)
}
 0x74a   :  { %s4896_s2 = scalar_lea.hbm %s6193_s9, 128 }
 0x74b   :  { %p4897_p3 = scmp.ne.s32.totalorder %s6193_s9, %s4896_s2  ;;  %p4900_p4 = scmp.lt.u32.totalorder %s4896_s2, %s6193_s9 }
 0x74d   :  { %p4902_p5 = pnand %p4900_p4, %p4897_p3 }
 0x74f   :  { %4905 = shalt.err (!%p4902_p5)
}
 0x750   :  { %2879 = dma.vmem_to_hbm [thread:$0]  %s2877_s28, 128, %s6193_s9, [#allocation4]  }
 0x751   :  { %4912 = dma.done.wait [#allocation4], 128  }
 0x752   :  { %4913 = vsyncadd [#allocation4], 4294967168 }
 0x753   :  { %2883 = vsyncpa [#allocation3], 1 }
 0x754   :  { %2884 = vsyncpa [#allocation6], 1 }
 0x755   :  { %2885 = vsyncpa [#allocation9], 1 }
 0x756   :  { %2886 = vsyncpa [#allocation4], 1 }

</bundles_post_ra>
